<compile_context>
chip_gen: v5e
topology: v5e:2x2
jax: 0.10.0
libtpu: 0.0.40
codegen_flags: <defaults>
</compile_context>

<pallas_src>
import functools

import jax
import jax.numpy as jnp
import numpy as np
from jax.experimental import pallas as pl
from jax.experimental.pallas import tpu as pltpu

EPS = 1e-20  # effcn squash_hinton eps (10e-21)


def _caps_routing_kernel(x_ref, w_ref, b0_ref, g_ref, o_ref, *,
                         n_l, d_l, n_h, d_h, n_iter):
    """One batch element: prediction matmul + agreement routing, lane-dense.

    x_ref : (1, n_l, d_l)   lower-capsule outputs for this batch element
    w_ref : (d_l, n_l, K)   prediction weights, K = n_h*d_h (contraction axis
                            leading -> cheap static slicing, no relayout)
    b0_ref: (n_l, K)        routing logits b, pre-broadcast over d_h lanes
    g_ref : (K, K)          constant block matrix of ones (d_h x d_h blocks);
                            (.) @ G = per-capsule group sums, lane-dense
    o_ref : (1, 1, K)       squashed higher-capsule outputs v (flat)
    """
    f32 = jnp.float32
    K = n_h * d_h

    x = x_ref[0].astype(f32)          # (n_l, d_l)
    G = g_ref[...]                    # (K, K)

    # u_predict[i, :] = x[i, :] @ W[i, :, :], kept flat as (n_l, K).
    # d_l is tiny: unrolled multiply-accumulate on the VPU, broadcasting one
    # (n_l, 1) column of x across the 128-lane axis per step.
    u = x[:, 0:1] * w_ref[0]
    for d in range(1, d_l):
        u = u + x[:, d:d + 1] * w_ref[d]          # (n_l, K) f32

    def coupling(bb):
        # Group softmax over n_h on broadcast-form logits bb[i,k] = b[i, k//d_h]:
        # each logit appears d_h times along lanes, so c = d_h * softmax(bb)
        # over all K lanes (lane max/sum -> XLU, exp -> EUP).
        m = jnp.max(bb, axis=-1, keepdims=True)
        e = jnp.exp(bb - m)
        return (float(d_h) * e) / jnp.sum(e, axis=-1, keepdims=True)

    def squash(s):
        # s: (1, K) flat higher-capsule pre-activation.  (s*s) @ G puts each
        # capsule's squared norm into every one of its lanes (stays lane-dense).
        # Broadcast to 8 sublanes first so the MXU tile is (8,128)-aligned.
        ss = jnp.broadcast_to(s * s, (8, K))
        sq = jnp.dot(ss, G, preferred_element_type=f32)[0:1]   # (1, K)
        norm = jnp.sqrt(sq)
        scale = sq / ((1.0 + sq) * (norm + EPS))
        return s * scale

    bb = b0_ref[...].astype(f32)                   # (n_l, K) broadcast-form logits
    cb = coupling(bb)                              # (n_l, K) broadcast-form couplings
    s = jnp.sum(cb * u, axis=0, keepdims=True)     # (1, K)
    v = squash(s)

    for _ in range(n_iter):
        # agreement a[i, j] = <u[i, j, :], v[j, :]>, broadcast over d_h lanes
        agree = jnp.dot(u * v, G, preferred_element_type=f32)   # (n_l, K)
        bb = bb + agree
        cb = coupling(bb)
        s = jnp.sum(cb * u, axis=0, keepdims=True)
        v = squash(s)

    o_ref[0] = v.astype(o_ref.dtype)               # (1, K)


def caps_layer_forward(caps_output, weights, b_logits, *, n_iter=3):
    """Forward pass of CapsLayer (prediction matmul + AgreementRouting).

    caps_output: (B, n_l, d_l)
    weights:     (n_l, d_l, n_h*d_h)   (the nn.Parameter of CapsLayer)
    b_logits:    (n_l, n_h)            routing prior (zeros in the module)
    returns      (B, n_h, d_h)
    """
    B, n_l, d_l = caps_output.shape
    K = weights.shape[-1]
    n_h = b_logits.shape[-1]
    d_h = K // n_h
    assert n_h * d_h == K

    # Layout plumbing, all hoisted out of the kernel (DMA'd once, VMEM-resident):
    w_t = jnp.transpose(weights.astype(jnp.float32), (1, 0, 2))      # (d_l, n_l, K)
    b0 = jnp.repeat(b_logits.astype(jnp.float32), d_h, axis=-1)      # (n_l, K)
    gi = np.arange(K)[:, None] // d_h
    gj = np.arange(K)[None, :] // d_h
    g = jnp.asarray((gi == gj).astype(np.float32))                   # (K, K)

    kernel = functools.partial(_caps_routing_kernel, n_l=n_l, d_l=d_l,
                               n_h=n_h, d_h=d_h, n_iter=n_iter)

    out = pl.pallas_call(
        kernel,
        out_shape=jax.ShapeDtypeStruct((B, 1, K), jnp.float32),
        grid_spec=pltpu.PrefetchScalarGridSpec(
            num_scalar_prefetch=0,
            grid=(B,),
            in_specs=[
                pl.BlockSpec((1, n_l, d_l), lambda i: (i, 0, 0)),
                pl.BlockSpec((d_l, n_l, K), lambda i: (0, 0, 0)),
                pl.BlockSpec((n_l, K), lambda i: (0, 0)),
                pl.BlockSpec((K, K), lambda i: (0, 0)),
            ],
            out_specs=pl.BlockSpec((1, 1, K), lambda i: (i, 0, 0)),
        ),
        compiler_params=pltpu.CompilerParams(
            dimension_semantics=("parallel",)),
    )(caps_output.astype(jnp.float32), w_t, b0, g)

    return out.reshape(B, n_h, d_h)


def _reference_forward(caps_output, weights, b_logits, *, n_iter):
    """Pure-JAX reference matching the PyTorch CapsLayer/AgreementRouting."""
    B, n_l, d_l = caps_output.shape
    K = weights.shape[-1]
    n_h = b_logits.shape[-1]
    d_h = K // n_h

    u = jnp.einsum('bid,idk->bik', caps_output, weights,
                   precision=jax.lax.Precision.HIGHEST).reshape(B, n_l, n_h, d_h)

    def squash(s):
        n = jnp.linalg.norm(s, axis=-1, keepdims=True)
        return (n ** 2 / (1.0 + n ** 2)) * (s / (n + EPS))

    c = jax.nn.softmax(b_logits, axis=-1)                     # (n_l, n_h)
    s = jnp.sum(c[None, :, :, None] * u, axis=1)              # (B, n_h, d_h)
    v = squash(s)
    bb = jnp.broadcast_to(b_logits, (B, n_l, n_h))
    for _ in range(n_iter):
        bb = bb + jnp.sum(u * v[:, None, :, :], axis=-1)
        c = jax.nn.softmax(bb, axis=-1)
        s = jnp.sum(c[..., None] * u, axis=1)
        v = squash(s)
    return v


if __name__ == "__main__":
    # Small, module-consistent shapes (K = n_h*d_h = 128 -> lane-dense).
    B, n_l, d_l = 2, 32, 8
    n_h, d_h = 8, 16
    n_iter = 3

    key = jax.random.PRNGKey(0)
    kx, kw = jax.random.split(key, 2)

    caps_output = jax.random.normal(kx, (B, n_l, d_l), dtype=jnp.float32)

    stdv = 1.0 / np.sqrt(n_l)  # matches CapsLayer.reset_parameters
    weights = jax.random.uniform(kw, (n_l, d_l, n_h * d_h),
                                 minval=-stdv, maxval=stdv, dtype=jnp.float32)
    b_logits = jnp.zeros((n_l, n_h), dtype=jnp.float32)  # nn.Parameter(zeros)

    out = caps_layer_forward(caps_output, weights, b_logits, n_iter=n_iter)
    out = jax.block_until_ready(out)

    ref = _reference_forward(caps_output, weights, b_logits, n_iter=n_iter)
    np.testing.assert_allclose(np.asarray(out), np.asarray(ref),
                               rtol=1e-4, atol=1e-4)
    assert out.shape == (B, n_h, d_h)

    print("KERNEL_OK")
</pallas_src>

<mosaic_0001>
module attributes {stable_mosaic.version = 11 : i64} {
  func.func @_caps_routing_kernel(%arg0: i32, %arg1: memref<1x32x8xf32, #tpu.memory_space<vmem>>, %arg2: memref<8x32x128xf32, #tpu.memory_space<vmem>>, %arg3: memref<32x128xf32, #tpu.memory_space<vmem>>, %arg4: memref<128x128xf32, #tpu.memory_space<vmem>>, %arg5: memref<1x1x128xf32, #tpu.memory_space<vmem>>) attributes {dimension_semantics = [#tpu.dimension_semantics<parallel>], iteration_bounds = array<i64: 2>, scalar_prefetch = 0 : i64, scratch_operands = 0 : i64, tpu.core_type = #tpu.core_type<tc>, window_params = [{transform_indices = @transform_0, window_bounds = array<i64: 1, 32, 8>}, {pipeline_mode = #tpu.pipeline_mode<synchronous>, transform_indices = @transform_1, window_bounds = array<i64: 8, 32, 128>}, {pipeline_mode = #tpu.pipeline_mode<synchronous>, transform_indices = @transform_2, window_bounds = array<i64: 32, 128>}, {pipeline_mode = #tpu.pipeline_mode<synchronous>, transform_indices = @transform_3, window_bounds = array<i64: 128, 128>}, {transform_indices = @transform_4, window_bounds = array<i64: 1, 1, 128>}]} {
    %c0 = arith.constant 0 : index
    %c0_0 = arith.constant 0 : index
    %c0_1 = arith.constant 0 : index
    %0 = vector.load %arg1[%c0, %c0_0, %c0_1] : memref<1x32x8xf32, #tpu.memory_space<vmem>>, vector<1x32x8xf32>
    %1 = vector.shape_cast %0 : vector<1x32x8xf32> to vector<32x8xf32>
    %c0_2 = arith.constant 0 : index
    %c0_3 = arith.constant 0 : index
    %2 = vector.load %arg4[%c0_2, %c0_3] : memref<128x128xf32, #tpu.memory_space<vmem>>, vector<128x128xf32>
    %3 = vector.extract_strided_slice %1 {offsets = [0, 0], sizes = [32, 1], strides = [1, 1]} : vector<32x8xf32> to vector<32x1xf32>
    %c0_4 = arith.constant 0 : index
    %c0_5 = arith.constant 0 : index
    %c0_6 = arith.constant 0 : index
    %4 = vector.load %arg2[%c0_4, %c0_5, %c0_6] : memref<8x32x128xf32, #tpu.memory_space<vmem>>, vector<1x32x128xf32>
    %5 = vector.shape_cast %4 : vector<1x32x128xf32> to vector<32x128xf32>
    %6 = vector.broadcast %3 : vector<32x1xf32> to vector<32x128xf32>
    %7 = arith.mulf %6, %5 : vector<32x128xf32>
    %8 = vector.extract_strided_slice %1 {offsets = [0, 1], sizes = [32, 1], strides = [1, 1]} : vector<32x8xf32> to vector<32x1xf32>
    %c1 = arith.constant 1 : index
    %c0_7 = arith.constant 0 : index
    %c0_8 = arith.constant 0 : index
    %9 = vector.load %arg2[%c1, %c0_7, %c0_8] : memref<8x32x128xf32, #tpu.memory_space<vmem>>, vector<1x32x128xf32>
    %10 = vector.shape_cast %9 : vector<1x32x128xf32> to vector<32x128xf32>
    %11 = vector.broadcast %8 : vector<32x1xf32> to vector<32x128xf32>
    %12 = arith.mulf %11, %10 : vector<32x128xf32>
    %13 = arith.addf %7, %12 : vector<32x128xf32>
    %14 = vector.extract_strided_slice %1 {offsets = [0, 2], sizes = [32, 1], strides = [1, 1]} : vector<32x8xf32> to vector<32x1xf32>
    %c2 = arith.constant 2 : index
    %c0_9 = arith.constant 0 : index
    %c0_10 = arith.constant 0 : index
    %15 = vector.load %arg2[%c2, %c0_9, %c0_10] : memref<8x32x128xf32, #tpu.memory_space<vmem>>, vector<1x32x128xf32>
    %16 = vector.shape_cast %15 : vector<1x32x128xf32> to vector<32x128xf32>
    %17 = vector.broadcast %14 : vector<32x1xf32> to vector<32x128xf32>
    %18 = arith.mulf %17, %16 : vector<32x128xf32>
    %19 = arith.addf %13, %18 : vector<32x128xf32>
    %20 = vector.extract_strided_slice %1 {offsets = [0, 3], sizes = [32, 1], strides = [1, 1]} : vector<32x8xf32> to vector<32x1xf32>
    %c3 = arith.constant 3 : index
    %c0_11 = arith.constant 0 : index
    %c0_12 = arith.constant 0 : index
    %21 = vector.load %arg2[%c3, %c0_11, %c0_12] : memref<8x32x128xf32, #tpu.memory_space<vmem>>, vector<1x32x128xf32>
    %22 = vector.shape_cast %21 : vector<1x32x128xf32> to vector<32x128xf32>
    %23 = vector.broadcast %20 : vector<32x1xf32> to vector<32x128xf32>
    %24 = arith.mulf %23, %22 : vector<32x128xf32>
    %25 = arith.addf %19, %24 : vector<32x128xf32>
    %26 = vector.extract_strided_slice %1 {offsets = [0, 4], sizes = [32, 1], strides = [1, 1]} : vector<32x8xf32> to vector<32x1xf32>
    %c4 = arith.constant 4 : index
    %c0_13 = arith.constant 0 : index
    %c0_14 = arith.constant 0 : index
    %27 = vector.load %arg2[%c4, %c0_13, %c0_14] : memref<8x32x128xf32, #tpu.memory_space<vmem>>, vector<1x32x128xf32>
    %28 = vector.shape_cast %27 : vector<1x32x128xf32> to vector<32x128xf32>
    %29 = vector.broadcast %26 : vector<32x1xf32> to vector<32x128xf32>
    %30 = arith.mulf %29, %28 : vector<32x128xf32>
    %31 = arith.addf %25, %30 : vector<32x128xf32>
    %32 = vector.extract_strided_slice %1 {offsets = [0, 5], sizes = [32, 1], strides = [1, 1]} : vector<32x8xf32> to vector<32x1xf32>
    %c5 = arith.constant 5 : index
    %c0_15 = arith.constant 0 : index
    %c0_16 = arith.constant 0 : index
    %33 = vector.load %arg2[%c5, %c0_15, %c0_16] : memref<8x32x128xf32, #tpu.memory_space<vmem>>, vector<1x32x128xf32>
    %34 = vector.shape_cast %33 : vector<1x32x128xf32> to vector<32x128xf32>
    %35 = vector.broadcast %32 : vector<32x1xf32> to vector<32x128xf32>
    %36 = arith.mulf %35, %34 : vector<32x128xf32>
    %37 = arith.addf %31, %36 : vector<32x128xf32>
    %38 = vector.extract_strided_slice %1 {offsets = [0, 6], sizes = [32, 1], strides = [1, 1]} : vector<32x8xf32> to vector<32x1xf32>
    %c6 = arith.constant 6 : index
    %c0_17 = arith.constant 0 : index
    %c0_18 = arith.constant 0 : index
    %39 = vector.load %arg2[%c6, %c0_17, %c0_18] : memref<8x32x128xf32, #tpu.memory_space<vmem>>, vector<1x32x128xf32>
    %40 = vector.shape_cast %39 : vector<1x32x128xf32> to vector<32x128xf32>
    %41 = vector.broadcast %38 : vector<32x1xf32> to vector<32x128xf32>
    %42 = arith.mulf %41, %40 : vector<32x128xf32>
    %43 = arith.addf %37, %42 : vector<32x128xf32>
    %44 = vector.extract_strided_slice %1 {offsets = [0, 7], sizes = [32, 1], strides = [1, 1]} : vector<32x8xf32> to vector<32x1xf32>
    %c7 = arith.constant 7 : index
    %c0_19 = arith.constant 0 : index
    %c0_20 = arith.constant 0 : index
    %45 = vector.load %arg2[%c7, %c0_19, %c0_20] : memref<8x32x128xf32, #tpu.memory_space<vmem>>, vector<1x32x128xf32>
    %46 = vector.shape_cast %45 : vector<1x32x128xf32> to vector<32x128xf32>
    %47 = vector.broadcast %44 : vector<32x1xf32> to vector<32x128xf32>
    %48 = arith.mulf %47, %46 : vector<32x128xf32>
    %49 = arith.addf %43, %48 : vector<32x128xf32>
    %c0_21 = arith.constant 0 : index
    %c0_22 = arith.constant 0 : index
    %50 = vector.load %arg3[%c0_21, %c0_22] : memref<32x128xf32, #tpu.memory_space<vmem>>, vector<32x128xf32>
    %cst = arith.constant dense<0xFF800000> : vector<32xf32>
    %51 = vector.multi_reduction <maximumf>, %50, %cst [1] : vector<32x128xf32> to vector<32xf32>
    %52 = vector.shape_cast %51 : vector<32xf32> to vector<32x1xf32>
    %53 = vector.broadcast %52 : vector<32x1xf32> to vector<32x128xf32>
    %54 = arith.subf %50, %53 : vector<32x128xf32>
    %55 = math.exp %54 : vector<32x128xf32>
    %cst_23 = arith.constant 1.600000e+01 : f32
    %56 = vector.broadcast %cst_23 : f32 to vector<32x128xf32>
    %57 = arith.mulf %56, %55 : vector<32x128xf32>
    %cst_24 = arith.constant dense<0.000000e+00> : vector<32xf32>
    %58 = vector.multi_reduction <add>, %55, %cst_24 [1] : vector<32x128xf32> to vector<32xf32>
    %59 = vector.shape_cast %58 : vector<32xf32> to vector<32x1xf32>
    %60 = vector.broadcast %59 : vector<32x1xf32> to vector<32x128xf32>
    %61 = arith.divf %57, %60 : vector<32x128xf32>
    %62 = arith.mulf %61, %49 : vector<32x128xf32>
    %cst_25 = arith.constant dense<0.000000e+00> : vector<128xf32>
    %63 = vector.multi_reduction <add>, %62, %cst_25 [0] : vector<32x128xf32> to vector<128xf32>
    %64 = vector.shape_cast %63 : vector<128xf32> to vector<1x128xf32>
    %65 = arith.mulf %64, %64 : vector<1x128xf32>
    %66 = vector.shape_cast %65 : vector<1x128xf32> to vector<1x128xf32>
    %67 = vector.broadcast %66 : vector<1x128xf32> to vector<8x128xf32>
    %cst_26 = arith.constant dense<0.000000e+00> : vector<8x128xf32>
    %68 = tpu.matmul %67, %2, %cst_26 {dimension_numbers = #tpu.dot_dimension_numbers<[1], [0], [0], [1], [0, 0, 1, 1], [], []>} : vector<8x128xf32>, vector<128x128xf32>, vector<8x128xf32> -> vector<8x128xf32>
    %69 = vector.extract_strided_slice %68 {offsets = [0, 0], sizes = [1, 128], strides = [1, 1]} : vector<8x128xf32> to vector<1x128xf32>
    %70 = math.sqrt %69 : vector<1x128xf32>
    %cst_27 = arith.constant 1.000000e+00 : f32
    %71 = vector.broadcast %cst_27 : f32 to vector<1x128xf32>
    %72 = arith.addf %71, %69 : vector<1x128xf32>
    %cst_28 = arith.constant 9.99999968E-21 : f32
    %73 = vector.broadcast %cst_28 : f32 to vector<1x128xf32>
    %74 = arith.addf %70, %73 : vector<1x128xf32>
    %75 = arith.mulf %72, %74 : vector<1x128xf32>
    %76 = arith.divf %69, %75 : vector<1x128xf32>
    %77 = arith.mulf %64, %76 : vector<1x128xf32>
    %78 = vector.broadcast %77 : vector<1x128xf32> to vector<32x128xf32>
    %79 = arith.mulf %49, %78 : vector<32x128xf32>
    %cst_29 = arith.constant dense<0.000000e+00> : vector<32x128xf32>
    %80 = tpu.matmul %79, %2, %cst_29 {dimension_numbers = #tpu.dot_dimension_numbers<[1], [0], [0], [1], [0, 0, 1, 1], [], []>} : vector<32x128xf32>, vector<128x128xf32>, vector<32x128xf32> -> vector<32x128xf32>
    %81 = arith.addf %50, %80 : vector<32x128xf32>
    %cst_30 = arith.constant dense<0xFF800000> : vector<32xf32>
    %82 = vector.multi_reduction <maximumf>, %81, %cst_30 [1] : vector<32x128xf32> to vector<32xf32>
    %83 = vector.shape_cast %82 : vector<32xf32> to vector<32x1xf32>
    %84 = vector.broadcast %83 : vector<32x1xf32> to vector<32x128xf32>
    %85 = arith.subf %81, %84 : vector<32x128xf32>
    %86 = math.exp %85 : vector<32x128xf32>
    %cst_31 = arith.constant 1.600000e+01 : f32
    %87 = vector.broadcast %cst_31 : f32 to vector<32x128xf32>
    %88 = arith.mulf %87, %86 : vector<32x128xf32>
    %cst_32 = arith.constant dense<0.000000e+00> : vector<32xf32>
    %89 = vector.multi_reduction <add>, %86, %cst_32 [1] : vector<32x128xf32> to vector<32xf32>
    %90 = vector.shape_cast %89 : vector<32xf32> to vector<32x1xf32>
    %91 = vector.broadcast %90 : vector<32x1xf32> to vector<32x128xf32>
    %92 = arith.divf %88, %91 : vector<32x128xf32>
    %93 = arith.mulf %92, %49 : vector<32x128xf32>
    %cst_33 = arith.constant dense<0.000000e+00> : vector<128xf32>
    %94 = vector.multi_reduction <add>, %93, %cst_33 [0] : vector<32x128xf32> to vector<128xf32>
    %95 = vector.shape_cast %94 : vector<128xf32> to vector<1x128xf32>
    %96 = arith.mulf %95, %95 : vector<1x128xf32>
    %97 = vector.shape_cast %96 : vector<1x128xf32> to vector<1x128xf32>
    %98 = vector.broadcast %97 : vector<1x128xf32> to vector<8x128xf32>
    %cst_34 = arith.constant dense<0.000000e+00> : vector<8x128xf32>
    %99 = tpu.matmul %98, %2, %cst_34 {dimension_numbers = #tpu.dot_dimension_numbers<[1], [0], [0], [1], [0, 0, 1, 1], [], []>} : vector<8x128xf32>, vector<128x128xf32>, vector<8x128xf32> -> vector<8x128xf32>
    %100 = vector.extract_strided_slice %99 {offsets = [0, 0], sizes = [1, 128], strides = [1, 1]} : vector<8x128xf32> to vector<1x128xf32>
    %101 = math.sqrt %100 : vector<1x128xf32>
    %cst_35 = arith.constant 1.000000e+00 : f32
    %102 = vector.broadcast %cst_35 : f32 to vector<1x128xf32>
    %103 = arith.addf %102, %100 : vector<1x128xf32>
    %cst_36 = arith.constant 9.99999968E-21 : f32
    %104 = vector.broadcast %cst_36 : f32 to vector<1x128xf32>
    %105 = arith.addf %101, %104 : vector<1x128xf32>
    %106 = arith.mulf %103, %105 : vector<1x128xf32>
    %107 = arith.divf %100, %106 : vector<1x128xf32>
    %108 = arith.mulf %95, %107 : vector<1x128xf32>
    %109 = vector.broadcast %108 : vector<1x128xf32> to vector<32x128xf32>
    %110 = arith.mulf %49, %109 : vector<32x128xf32>
    %cst_37 = arith.constant dense<0.000000e+00> : vector<32x128xf32>
    %111 = tpu.matmul %110, %2, %cst_37 {dimension_numbers = #tpu.dot_dimension_numbers<[1], [0], [0], [1], [0, 0, 1, 1], [], []>} : vector<32x128xf32>, vector<128x128xf32>, vector<32x128xf32> -> vector<32x128xf32>
    %112 = arith.addf %81, %111 : vector<32x128xf32>
    %cst_38 = arith.constant dense<0xFF800000> : vector<32xf32>
    %113 = vector.multi_reduction <maximumf>, %112, %cst_38 [1] : vector<32x128xf32> to vector<32xf32>
    %114 = vector.shape_cast %113 : vector<32xf32> to vector<32x1xf32>
    %115 = vector.broadcast %114 : vector<32x1xf32> to vector<32x128xf32>
    %116 = arith.subf %112, %115 : vector<32x128xf32>
    %117 = math.exp %116 : vector<32x128xf32>
    %cst_39 = arith.constant 1.600000e+01 : f32
    %118 = vector.broadcast %cst_39 : f32 to vector<32x128xf32>
    %119 = arith.mulf %118, %117 : vector<32x128xf32>
    %cst_40 = arith.constant dense<0.000000e+00> : vector<32xf32>
    %120 = vector.multi_reduction <add>, %117, %cst_40 [1] : vector<32x128xf32> to vector<32xf32>
    %121 = vector.shape_cast %120 : vector<32xf32> to vector<32x1xf32>
    %122 = vector.broadcast %121 : vector<32x1xf32> to vector<32x128xf32>
    %123 = arith.divf %119, %122 : vector<32x128xf32>
    %124 = arith.mulf %123, %49 : vector<32x128xf32>
    %cst_41 = arith.constant dense<0.000000e+00> : vector<128xf32>
    %125 = vector.multi_reduction <add>, %124, %cst_41 [0] : vector<32x128xf32> to vector<128xf32>
    %126 = vector.shape_cast %125 : vector<128xf32> to vector<1x128xf32>
    %127 = arith.mulf %126, %126 : vector<1x128xf32>
    %128 = vector.shape_cast %127 : vector<1x128xf32> to vector<1x128xf32>
    %129 = vector.broadcast %128 : vector<1x128xf32> to vector<8x128xf32>
    %cst_42 = arith.constant dense<0.000000e+00> : vector<8x128xf32>
    %130 = tpu.matmul %129, %2, %cst_42 {dimension_numbers = #tpu.dot_dimension_numbers<[1], [0], [0], [1], [0, 0, 1, 1], [], []>} : vector<8x128xf32>, vector<128x128xf32>, vector<8x128xf32> -> vector<8x128xf32>
    %131 = vector.extract_strided_slice %130 {offsets = [0, 0], sizes = [1, 128], strides = [1, 1]} : vector<8x128xf32> to vector<1x128xf32>
    %132 = math.sqrt %131 : vector<1x128xf32>
    %cst_43 = arith.constant 1.000000e+00 : f32
    %133 = vector.broadcast %cst_43 : f32 to vector<1x128xf32>
    %134 = arith.addf %133, %131 : vector<1x128xf32>
    %cst_44 = arith.constant 9.99999968E-21 : f32
    %135 = vector.broadcast %cst_44 : f32 to vector<1x128xf32>
    %136 = arith.addf %132, %135 : vector<1x128xf32>
    %137 = arith.mulf %134, %136 : vector<1x128xf32>
    %138 = arith.divf %131, %137 : vector<1x128xf32>
    %139 = arith.mulf %126, %138 : vector<1x128xf32>
    %140 = vector.broadcast %139 : vector<1x128xf32> to vector<32x128xf32>
    %141 = arith.mulf %49, %140 : vector<32x128xf32>
    %cst_45 = arith.constant dense<0.000000e+00> : vector<32x128xf32>
    %142 = tpu.matmul %141, %2, %cst_45 {dimension_numbers = #tpu.dot_dimension_numbers<[1], [0], [0], [1], [0, 0, 1, 1], [], []>} : vector<32x128xf32>, vector<128x128xf32>, vector<32x128xf32> -> vector<32x128xf32>
    %143 = arith.addf %112, %142 : vector<32x128xf32>
    %cst_46 = arith.constant dense<0xFF800000> : vector<32xf32>
    %144 = vector.multi_reduction <maximumf>, %143, %cst_46 [1] : vector<32x128xf32> to vector<32xf32>
    %145 = vector.shape_cast %144 : vector<32xf32> to vector<32x1xf32>
    %146 = vector.broadcast %145 : vector<32x1xf32> to vector<32x128xf32>
    %147 = arith.subf %143, %146 : vector<32x128xf32>
    %148 = math.exp %147 : vector<32x128xf32>
    %cst_47 = arith.constant 1.600000e+01 : f32
    %149 = vector.broadcast %cst_47 : f32 to vector<32x128xf32>
    %150 = arith.mulf %149, %148 : vector<32x128xf32>
    %cst_48 = arith.constant dense<0.000000e+00> : vector<32xf32>
    %151 = vector.multi_reduction <add>, %148, %cst_48 [1] : vector<32x128xf32> to vector<32xf32>
    %152 = vector.shape_cast %151 : vector<32xf32> to vector<32x1xf32>
    %153 = vector.broadcast %152 : vector<32x1xf32> to vector<32x128xf32>
    %154 = arith.divf %150, %153 : vector<32x128xf32>
    %155 = arith.mulf %154, %49 : vector<32x128xf32>
    %cst_49 = arith.constant dense<0.000000e+00> : vector<128xf32>
    %156 = vector.multi_reduction <add>, %155, %cst_49 [0] : vector<32x128xf32> to vector<128xf32>
    %157 = vector.shape_cast %156 : vector<128xf32> to vector<1x128xf32>
    %158 = arith.mulf %157, %157 : vector<1x128xf32>
    %159 = vector.shape_cast %158 : vector<1x128xf32> to vector<1x128xf32>
    %160 = vector.broadcast %159 : vector<1x128xf32> to vector<8x128xf32>
    %cst_50 = arith.constant dense<0.000000e+00> : vector<8x128xf32>
    %161 = tpu.matmul %160, %2, %cst_50 {dimension_numbers = #tpu.dot_dimension_numbers<[1], [0], [0], [1], [0, 0, 1, 1], [], []>} : vector<8x128xf32>, vector<128x128xf32>, vector<8x128xf32> -> vector<8x128xf32>
    %162 = vector.extract_strided_slice %161 {offsets = [0, 0], sizes = [1, 128], strides = [1, 1]} : vector<8x128xf32> to vector<1x128xf32>
    %163 = math.sqrt %162 : vector<1x128xf32>
    %cst_51 = arith.constant 1.000000e+00 : f32
    %164 = vector.broadcast %cst_51 : f32 to vector<1x128xf32>
    %165 = arith.addf %164, %162 : vector<1x128xf32>
    %cst_52 = arith.constant 9.99999968E-21 : f32
    %166 = vector.broadcast %cst_52 : f32 to vector<1x128xf32>
    %167 = arith.addf %163, %166 : vector<1x128xf32>
    %168 = arith.mulf %165, %167 : vector<1x128xf32>
    %169 = arith.divf %162, %168 : vector<1x128xf32>
    %170 = arith.mulf %157, %169 : vector<1x128xf32>
    %c0_53 = arith.constant 0 : index
    %c0_54 = arith.constant 0 : index
    %c0_55 = arith.constant 0 : index
    %171 = vector.load %arg5[%c0_53, %c0_54, %c0_55] : memref<1x1x128xf32, #tpu.memory_space<vmem>>, vector<1x1x128xf32>
    %172 = vector.shape_cast %171 : vector<1x1x128xf32> to vector<1x128xf32>
    %173 = vector.shape_cast %170 : vector<1x128xf32> to vector<1x1x128xf32>
    tpu.vector_store %arg5[%c0_53, %c0_54, %c0_55], %173 {strides = array<i32>} : memref<1x1x128xf32, #tpu.memory_space<vmem>>, vector<1x1x128xf32>,
    return
  }
  func.func @transform_0(%arg0: i32) -> (i32, i32, i32) {
    %c0_i32 = arith.constant 0 : i32
    %c0_i32_0 = arith.constant 0 : i32
    %c0_i32_1 = arith.constant 0 : i32
    return %arg0, %c0_i32, %c0_i32_0 : i32, i32, i32
  }
  func.func @transform_1(%arg0: i32) -> (i32, i32, i32) {
    %c0_i32 = arith.constant 0 : i32
    %c0_i32_0 = arith.constant 0 : i32
    %c0_i32_1 = arith.constant 0 : i32
    %c0_i32_2 = arith.constant 0 : i32
    return %c0_i32, %c0_i32_0, %c0_i32_1 : i32, i32, i32
  }
  func.func @transform_2(%arg0: i32) -> (i32, i32) {
    %c0_i32 = arith.constant 0 : i32
    %c0_i32_0 = arith.constant 0 : i32
    %c0_i32_1 = arith.constant 0 : i32
    return %c0_i32, %c0_i32_0 : i32, i32
  }
  func.func @transform_3(%arg0: i32) -> (i32, i32) {
    %c0_i32 = arith.constant 0 : i32
    %c0_i32_0 = arith.constant 0 : i32
    %c0_i32_1 = arith.constant 0 : i32
    return %c0_i32, %c0_i32_0 : i32, i32
  }
  func.func @transform_4(%arg0: i32) -> (i32, i32, i32) {
    %c0_i32 = arith.constant 0 : i32
    %c0_i32_0 = arith.constant 0 : i32
    %c0_i32_1 = arith.constant 0 : i32
    return %arg0, %c0_i32, %c0_i32_0 : i32, i32, i32
  }
}

</mosaic_0001>

<bundles_post_ra>
// kernel: tpu_custom_call.1
= control target key start
LH: loop header
LB: loop body
LE: loop exit
PB: predicated region body
PF: predicated region fallthrough
CT: control target
= control target key end

     0   :  { %9 = vsyncpa [#allocation3], 0  ;;  %s2286_s0 = inlined_call_operand.vmem [shape: f32[2,32,8], index: 0, kind: input, shape index: {}]   ;;  %s2287_s1 = inlined_call_operand.hbm [shape: f32[8,32,128], index: 1, kind: input, shape index: {}]   ;;  %s2288_s2 = inlined_call_operand.vmem [shape: f32[32,128], index: 2, kind: input, shape index: {}]   ;;  %s2289_s3 = inlined_call_operand.hbm [shape: f32[128,128], index: 3, kind: input, shape index: {}]   ;;  %s2290_s4 = inlined_call_operand.hbm [shape: f32[2,1,128], index: 4, kind: output, shape index: {}]  }
   0x1   :  { %10 = vsyncpa [#allocation6], 0 }
   0x2   :  { %11 = vsyncpa [#allocation4], 0 }
   0x3   :  { %13 = vsyncpa [#allocation4 + $0x1], 0  ;;  %s1690_s15 = smov 0   ;;  %s1692_s16 = smov 0  }
   0x4   :  { %s1694_s17 = smov 0   ;;  %s1696_s18 = smov 0  }
   0x5 LB: > { %s1711_s19 = sadd.s32 4294967295, %s1651_s18   ;;  %s1317_s20 = sadd.s32 4294967294, %s1651_s18   ;;  %s1651_s18 = sphi %s1696_s18, %s2307_s18   ;;  %s1647_s17 = sphi %s1694_s17, %s2306_s17   ;;  %s1643_s16 = sphi %s1692_s16, %s2305_s16   ;;  %s1639_s15 = sphi %s1690_s15, %s2304_s15  }
   0x6   : > { %s1715_s21 = sadd.s32 1, %s1651_s18   ;;  %s115_s22 = sadd.s32 1, %s1647_s17 }
   0x7   : > { %s112_s23 = ssub.s32 %s1651_s18, %s1715_s21  ;;  %p125_p0 = scmp.ne.s32.totalorder %s1647_s17, %s1643_s16 }
   0x8   : > { %p113_p1 = scmp.eq.s32.totalorder %s112_s23, 0  ;;  %p126_p2 = scmp.eq.s32.totalorder %s1711_s19, 1 }
   0x9   : > { %p131_p3 = scmp.ne.s32.totalorder %s1643_s16, %s1639_s15  ;;  %p132_p4 = scmp.eq.s32.totalorder %s1317_s20, 1 }
   0xa   : > { %s1726_s24 = scalar_select %p113_p1, %s1647_s17, %s115_s22  }
   0xb   : > { %p1728_p5 = por %p126_p2, %p125_p0  ;;  %p1732_p6 = por %p132_p4, %p131_p3 }
   0xc   : > { %p1318_p7 = scmp.ge.s32.totalorder %s1651_s18, 1  ;;  %p139_p8 = scmp.lt.s32.totalorder %s1651_s18, 3 }
   0xd   : > { %p1367_p9 = scmp.eq.s32.totalorder %s1711_s19, 0  ;;  %s150_s30 = sshll.u32 %s2287_s1, 4  ;;  %s151_s30 = int_to_ptr.hbm [resolvable:$true] %s150_s30 }
   0xe   : > { %p1739_p10 = pnand %p1318_p7, %p139_p8  ;;  %s1653_s5 = smov [#allocation2]  }
   0xf   : > { %s152_s6 = sshll.u32 %s1653_s5, 4  ;;  %s167_s9 = sshll.u32 %s2289_s3, 4  ;;  %s153_s6 = int_to_ptr.vmem [resolvable:$true] %s152_s6  ;;  %s168_s9 = int_to_ptr.hbm [resolvable:$true] %s167_s9 }
  0x10   : > { %p1356_p11 = pneg %p1739_p10  ;;  %s1654_s10 = smov 128  }
  0x11   : > { %s1655_s11 = smov 8   ;;  %s1656_s12 = smov [#allocation5]  }
  0x12   : > { %p1357_p12 = pnand %p1367_p9, %p1356_p11  ;;  %s169_s13 = sshll.u32 %s1656_s12, 4  ;;  %s170_s13 = int_to_ptr.vmem [resolvable:$true] %s169_s13 }
  0x13   : > { %193 = sbr.rel (%p1739_p10) target bundleno = 2359 (0x937), region = 36 }
  0x14   : > { %1359 = dma.hbm_to_vmem [thread:$0]  (!%p1357_p12), %s151_s30, 4096, %s153_s6, [#allocation3], %s1654_s10, %s1654_s10, %s1655_s11  }
  0x15   : > { %1362 = dma.hbm_to_vmem [thread:$0]  (!%p1357_p12), %s168_s9, 2048, %s170_s13, [#allocation6], %s1654_s10, %s1654_s10, %s1655_s11  }
  0x18   : > { %1626 = dma.done.wait (%p1367_p9), [#allocation3], 4096  }
  0x19   : > { %1628 = vsyncadd (%p1367_p9), [#allocation3], 4294963200 }
  0x1a   : > { %1630 = dma.done.wait (%p1367_p9), [#allocation6], 2048  }
  0x1b   : > { %1632 = vsyncadd (%p1367_p9), [#allocation6], 4294965248  ;;  %p224_p13 = scmp.lt.s32.totalorder %s1711_s19, 1  ;;  %v1657_v0 = vmov 0   ;;  %v1658_v1 = vmov 1   ;;  %v1771_v2 = vld [vmem:[%s2288_s2 + $0x10] sm:$0xff]  ;;  %s1236_s13 = scalar_lea.hbm %s2290_s4, %s1711_s19 }
  0x1c   : > { %1417 = vset.pattern.permute.xlu2 %v1657_v0  ;;  %1418 = vset.pattern.permute.xlu0 %v1658_v1  ;;  %v1776_v3 = vld [vmem:[%s2288_s2] sm:$0xff]  ;;  %v1786_v5 = vld [vmem:[%s2288_s2 + $0x18] sm:$0xff]  ;;  %v1791_v6 = vld [vmem:[%s2288_s2 + $0x8] sm:$0xff]  ;;  %v1659_v10 = vmov 2   ;;  %v1660_v11 = vmov 3   ;;  %v1661_v12 = vmov 4  }
  0x1d   : > { %s225_s14 = scalar_select %p224_p13, %s1711_s19, 1  ;;  %1416 = vset.pattern.permute.xlu1 %v1657_v0  ;;  %484 = vmax.xlane.f32.xlu0 %v1776_v3  ;;  %v1662_v13 = vmov 5   ;;  %v1663_v14 = vmov 6   ;;  %v250_v16 = vld [vmem:[#allocation2 + $0x8] sm:$0xff]  ;;  %v251_v24 = vld [vmem:[#allocation2 + $0x10] sm:$0xff]  ;;  %v1664_v57 = vmov 7  }
  0x1e   : > { %488 = vmax.xlane.f32.xlu1 %v1771_v2  ;;  %v279_v17 = vld [vmem:[#allocation2 + $0x28] sm:$0xff]  ;;  %v280_v26 = vld [vmem:[#allocation2 + $0x30] sm:$0xff]  ;;  %s222_s10 = sand.u32 1, %s1643_s16   ;;  %s1240_s22 = sshll.u32 %s1236_s13, 4  ;;  %s1241_s22 = int_to_ptr.hbm [resolvable:$true] %s1240_s22 }
  0x1f   : > { %s1329_s20 = sshll.u32 %s225_s14, 5  ;;  %v308_v36 = vld [vmem:[#allocation2 + $0x48] sm:$0xff]  ;;  %v309_v49 = vld [vmem:[#allocation2 + $0x50] sm:$0xff]  ;;  %s223_s14 = scalar_lea.vmem [#allocation7], %s222_s10 }
  0x20   : > { %s228_s27 = scalar_lea.vmem %s2286_s0, %s1329_s20  ;;  %v337_v54 = vld [vmem:[#allocation2 + $0x68] sm:$0xff]  ;;  %v338_v59 = vld [vmem:[#allocation2 + $0x70] sm:$0xff]  ;;  %s1238_s20 = sshll.u32 %s223_s14, 4  ;;  %s1239_s20 = int_to_ptr.vmem [resolvable:$true] %s1238_s20 }
  0x21   : > { %v1778_v4 = vld [vmem:[%s228_s27 + $0x8] sm:$0xff]  ;;  %v1796_v7 = vld [vmem:[%s228_s27 + $0x10] sm:$0xff]  ;;  %v1799_v8 = vld [vmem:[%s228_s27] sm:$0xff]  ;;  %s1228_s23 = scalar_lea.sflag [#allocation4], %s222_s10  ;;  %s1601_s30 = scalar_lea.hbm %s2290_s4, 2 }
  0x22   : > { %260 = vperm.xlu2 %1417, %v1778_v4   ;;  %v1804_v9 = vld [vmem:[%s228_s27 + $0x18] sm:$0xff]  ;;  %s1595_s27 = sshra.s32 %s1241_s22, 4  ;;  %s1596_s27 = int_to_ptr.hbm [resolvable:$true] %s1595_s27 }
  0x23   : > { %s1597_s28 = scalar_lea.hbm %s1596_s27, 1  ;;  %p1602_p3 = scmp.lt.s32.totalorder %s1596_s27, %s2290_s4 }
  0x24   : > { %p1598_p0 = scmp.ne.s32.totalorder %s1596_s27, %s1597_s28  ;;  %p1603_p4 = scmp.lt.s32.totalorder %s1601_s30, %s1597_s28 }
  0x25   : > { %486 = vmax.xlane.f32.xlu0 %v1791_v6 }
  0x26   : > { %490 = vmax.xlane.f32.xlu1 %v1786_v5  ;;  %p1599_p1 = pnand %p1598_p0, %p1728_p5  ;;  %p1604_p7 = por %p1603_p4, %p1602_p3 }
  0x28   : > { %p1600_p2 = pneg %p1599_p1 }
  0x2a   : > { %1419 = vset.pattern.permute.xlu2 %v1658_v1  ;;  %p1605_p8 = pnand %p1604_p7, %p1600_p2 }
  0x2b   : > { %287 = vperm.xlu2 %1419, %v1778_v4  }
  0x33   : > { %1420 = vset.pattern.permute.xlu2 %v1657_v0 }
  0x34   : > { %265 = vperm.xlu2 %1420, %v1796_v7  }
  0x39   : > { %283 = vperm.xlu0 %1418, %v1799_v8  }
  0x3c   : > { %1421 = vset.pattern.permute.xlu2 %v1658_v1 }
  0x3d   : > { %291 = vperm.xlu2 %1421, %v1796_v7  }
  0x3f   : > { %255 = vperm.xlu1 %1416, %v1799_v8  }
  0x41   : > { %295 = vperm.xlu0 %1418, %v1804_v9  }
  0x45   : > { %1422 = vset.pattern.permute.xlu2 %v1659_v10 }
  0x46   : > { %316 = vperm.xlu2 %1422, %v1778_v4  }
  0x47   : > { %1426 = vset.pattern.permute.xlu1 %v1660_v11 }
  0x48   : > { %341 = vperm.xlu1 %1426, %v1799_v8  }
  0x49   : > { %1424 = vset.pattern.permute.xlu0 %v1659_v10 }
  0x4a   : > { %312 = vperm.xlu0 %1424, %v1799_v8  }
  0x4e   : > { %1423 = vset.pattern.permute.xlu2 %v1657_v0 }
  0x4f   : > { %270 = vperm.xlu2 %1423, %v1804_v9  }
  0x50   : > { %1429 = vset.pattern.permute.xlu1 %v1661_v12 }
  0x51   : > { %374 = vperm.xlu1 %1429, %v1778_v4  }
  0x52   : > { %324 = vperm.xlu0 %1424, %v1804_v9  }
  0x57   : > { %1425 = vset.pattern.permute.xlu2 %v1659_v10 }
  0x58   : > { %320 = vperm.xlu2 %1425, %v1796_v7  }
  0x59   : > { %1431 = vset.pattern.permute.xlu1 %v1662_v13 }
  0x5a   : > { %399 = vperm.xlu1 %1431, %v1799_v8   ;;  %1430 = vset.pattern.permute.xlu0 %v1660_v11 }
  0x5b   : > { %353 = vperm.xlu0 %1430, %v1804_v9  }
  0x60   : > { %1427 = vset.pattern.permute.xlu2 %v1660_v11 }
  0x61   : > { %345 = vperm.xlu2 %1427, %v1778_v4  }
  0x62   : > { %1433 = vset.pattern.permute.xlu1 %v1661_v12 }
  0x63   : > { %382 = vperm.xlu1 %1433, %v1804_v9   ;;  %1434 = vset.pattern.permute.xlu0 %v1662_v13 }
  0x69   : > { %349 = vperm.xlu2 %1427, %v1796_v7  }
  0x6b   : > { %1436 = vset.pattern.permute.xlu1 %v1663_v14 }
  0x6c   : > { %432 = vperm.xlu1 %1436, %v1778_v4  }
  0x71   : > { %1428 = vset.pattern.permute.xlu2 %v1661_v12 }
  0x72   : > { %370 = vperm.xlu2 %1428, %v1799_v8  }
  0x7a   : > { %378 = vperm.xlu2 %1428, %v1796_v7  }
  0x7c   : > { %v261_v15 = vpop.permute.xlu2 %260 }
  0x7d   : > { %v274_v19 = vmul.f32 %v261_v15, %v250_v16 }
  0x82   : > { %1432 = vset.pattern.permute.xlu2 %v1662_v13 }
  0x83   : > { %403 = vperm.xlu2 %1432, %v1778_v4  }
  0x85   : > { %v288_v18 = vpop.permute.xlu2 %287 }
  0x86   : > { %v299_v20 = vmul.f32 %v288_v18, %v279_v17  ;;  %v1878_v17 = vld [vmem:[#allocation5 + $0x78] sm:$0xff]  ;;  %v278_v18 = vld [vmem:[#allocation2 + $0x20] sm:$0xff] }
  0x87   : > { %590 = vmatpush.msra.mxu0 %v1878_v17  ;;  %646 = vmatpush.msra.mxu1 %v1878_v17 }
  0x88   : > { %v303_v21 = vadd.f32 %v299_v20, %v274_v19  ;;  %v249_v19 = vld [vmem:[#allocation2] sm:$0xff]  ;;  %785 = vmatpush.msra.mxu2 %v1878_v17  ;;  %841 = vmatpush.msra.mxu3 %v1878_v17 }
  0x8b   : > { %1435 = vset.pattern.permute.xlu2 %v1663_v14 }
  0x8e   : > { %v266_v22 = vpop.permute.xlu2 %265 }
  0x8f   : > { %v275_v30 = vmul.f32 %v266_v22, %v251_v24  ;;  %v1887_v22 = vld [vmem:[#allocation5 + $0x68] sm:$0xff] }
  0x90   : > { %v485_v27 = vpop.xlane.xlu0 %484 }
  0x91   : > { %v489_v23 = vpop.xlane.xlu1 %488  ;;  %v492_v33 = vsub.f32 %v1776_v3, %v485_v27 }
  0x92   : > { %v494_v25 = vsub.f32 %v1771_v2, %v489_v23 }
  0x93   : > { %v496_v39 = vmul.f32 1.442695, %v492_v33  ;;  %v336_v33 = vld [vmem:[#allocation2 + $0x60] sm:$0xff] }
  0x94   : > { %v500_v28 = vmul.f32 1.442695, %v494_v25  ;;  %v307_v25 = vld [vmem:[#allocation2 + $0x40] sm:$0xff] }
  0x96   : > { %1441 = vpow2.f32 %v500_v28 }
  0x97   : > { %v292_v29 = vpop.permute.xlu2 %291 }
  0x98   : > { %v300_v31 = vmul.f32 %v292_v29, %v280_v26  ;;  %v487_v41 = vpop.xlane.xlu0 %486  ;;  %v1897_v26 = vld [vmem:[#allocation5 + $0x60] sm:$0xff] }
  0x99   : > { %v491_v34 = vpop.xlane.xlu1 %490  ;;  %v493_v44 = vsub.f32 %v1791_v6, %v487_v41 }
  0x9a   : > { %v304_v32 = vadd.f32 %v300_v31, %v275_v30  ;;  %v495_v35 = vsub.f32 %v1786_v5, %v491_v34 }
  0x9b   : > { %v498_v46 = vmul.f32 1.442695, %v493_v44 }
  0x9c   : > { %v1829_v37 = vpop.eup %1441  ;;  %v502_v38 = vmul.f32 1.442695, %v495_v35  ;;  %v281_v35 = vld [vmem:[#allocation2 + $0x38] sm:$0xff] }
  0x9d   : > { %512 = vadd.xlane.f32.xlu0 %v1829_v37 }
  0x9e   : > { %1443 = vpow2.f32 %v502_v38  ;;  %v1921_v38 = vld [vmem:[#allocation5 + $0x48] sm:$0xff] }
  0x9f   : > { %1445 = vpow2.f32 %v496_v39 }
  0xa0   : > { %v317_v40 = vpop.permute.xlu2 %316  ;;  %1447 = vpow2.f32 %v498_v46  ;;  %v310_v46 = vld [vmem:[#allocation2 + $0x58] sm:$0xff] }
  0xa1   : > { %v328_v42 = vmul.f32 %v317_v40, %v308_v36  ;;  %v1919_v36 = vld [vmem:[#allocation5 + $0x50] sm:$0xff]  ;;  %v252_v40 = vld [vmem:[#allocation2 + $0x18] sm:$0xff] }
  0xa3   : > { %v332_v43 = vadd.f32 %v328_v42, %v303_v21  ;;  %v1885_v21 = vld [vmem:[#allocation5 + $0x70] sm:$0xff] }
  0xa4   : > { %v1833_v45 = vpop.eup %1443  ;;  %591 = vmatpush.msra.mxu0 %v1885_v21  ;;  %647 = vmatpush.msra.mxu1 %v1885_v21 }
  0xa5   : > { %514 = vadd.xlane.f32.xlu1 %v1833_v45  ;;  %v1836_v47 = vpop.eup %1445  ;;  %786 = vmatpush.msra.mxu2 %v1885_v21 }
  0xa6   : > { %v1841_v50 = vpop.eup %1447  ;;  %842 = vmatpush.msra.mxu3 %v1885_v21  ;;  %592 = vmatpush.msra.mxu0 %v1887_v22 }
  0xa7   : > { %648 = vmatpush.msra.mxu1 %v1887_v22  ;;  %787 = vmatpush.msra.mxu2 %v1887_v22 }
  0xa8   : > { %843 = vmatpush.msra.mxu3 %v1887_v22  ;;  %593 = vmatpush.msra.mxu0 %v1897_v26 }
  0xa9   : > { %v1838_v48 = vpop.permute.xlu2 %270  ;;  %649 = vmatpush.msra.mxu1 %v1897_v26  ;;  %788 = vmatpush.msra.mxu2 %v1897_v26 }
  0xaa   : > { %844 = vmatpush.msra.mxu3 %v1897_v26 }
  0xab   : > { %v284_v0 = vpop.permute.xlu0 %283 }
  0xac   : > { %508 = vadd.xlane.f32.xlu2 %v1836_v47  ;;  %v298_v23 = vmul.f32 %v284_v0, %v278_v18 }
  0xb1   : > { %407 = vperm.xlu0 %1434, %v1796_v7   ;;  %v256_v63 = vpop.permute.xlu1 %255 }
  0xb2   : > { %v321_v51 = vpop.permute.xlu2 %320  ;;  %v273_v24 = vmul.f32 %v256_v63, %v249_v19 }
  0xb3   : > { %v329_v52 = vmul.f32 %v321_v51, %v309_v49  ;;  %v1858_v10 = vpop.permute.xlu0 %295  ;;  %v365_v49 = vld [vmem:[#allocation2 + $0x80] sm:$0xff] }
  0xb4   : > { %510 = vadd.xlane.f32.xlu2 %v1841_v50  ;;  %v302_v30 = vadd.f32 %v298_v23, %v273_v24  ;;  %v301_v44 = vmul.f32 %v1858_v10, %v281_v35  ;;  %v1965_v24 = vld [vmem:[#allocation5 + $0x28] sm:$0xff]  ;;  %v1977_v35 = vld [vmem:[#allocation5 + $0x20] sm:$0xff] }
  0xb5   : > { %v333_v53 = vadd.f32 %v329_v52, %v304_v32  ;;  %v1910_v32 = vld [vmem:[#allocation5 + $0x58] sm:$0xff] }
  0xb6   : > { %594 = vmatpush.msra.mxu0 %v1910_v32  ;;  %650 = vmatpush.msra.mxu1 %v1910_v32  ;;  %v1939_v52 = vld [vmem:[#allocation5 + $0x38] sm:$0xff] }
  0xb7   : > { %789 = vmatpush.msra.mxu2 %v1910_v32  ;;  %845 = vmatpush.msra.mxu3 %v1910_v32 }
  0xb8   : > { %595 = vmatpush.msra.mxu0 %v1919_v36  ;;  %651 = vmatpush.msra.mxu1 %v1919_v36 }
  0xb9   : > { %1438 = vset.pattern.permute.xlu0 %v1664_v57  ;;  %790 = vmatpush.msra.mxu2 %v1919_v36 }
  0xba   : > { %457 = vperm.xlu0 %1438, %v1799_v8   ;;  %v342_v1 = vpop.permute.xlu1 %341  ;;  %846 = vmatpush.msra.mxu3 %v1919_v36 }
  0xbb   : > { %v346_v55 = vpop.permute.xlu2 %345  ;;  %v356_v41 = vmul.f32 %v342_v1, %v336_v33  ;;  %596 = vmatpush.msra.mxu0 %v1921_v38  ;;  %652 = vmatpush.msra.mxu1 %v1921_v38 }
  0xbc   : > { %v357_v56 = vmul.f32 %v346_v55, %v337_v54  ;;  %v313_v12 = vpop.permute.xlu0 %312  ;;  %791 = vmatpush.msra.mxu2 %v1921_v38  ;;  %847 = vmatpush.msra.mxu3 %v1921_v38  ;;  %v366_v54 = vld [vmem:[#allocation2 + $0x88] sm:$0xff]  ;;  %v394_v55 = vld [vmem:[#allocation2 + $0xa0] sm:$0xff] }
  0xbd   : > { %v327_v31 = vmul.f32 %v313_v12, %v307_v25 }
  0xbe   : > { %v1846_v58 = vadd.f32 %v357_v56, %v332_v43  ;;  %436 = vperm.xlu1 %1436, %v1796_v7   ;;  %v1930_v43 = vld [vmem:[#allocation5 + $0x40] sm:$0xff]  ;;  %v339_v56 = vld [vmem:[#allocation2 + $0x78] sm:$0xff] }
  0xbf   : > { %v331_v42 = vadd.f32 %v327_v31, %v302_v30  ;;  %597 = vmatpush.msra.mxu0 %v1930_v43  ;;  %653 = vmatpush.msra.mxu1 %v1930_v43 }
  0xc0   : > { %792 = vmatpush.msra.mxu2 %v1930_v43  ;;  %848 = vmatpush.msra.mxu3 %v1930_v43 }
  0xc1   : > { %v360_v0 = vadd.f32 %v356_v41, %v331_v42  ;;  %598 = vmatpush.msra.mxu0 %v1939_v52  ;;  %654 = vmatpush.msra.mxu1 %v1939_v52  ;;  %v1986_v41 = vmul.f32 16.0, %v1836_v47 }
  0xc2   : > { %793 = vmatpush.msra.mxu2 %v1939_v52  ;;  %849 = vmatpush.msra.mxu3 %v1939_v52 }
  0xc3   : > { %v350_v60 = vpop.permute.xlu2 %349  ;;  %v1860_v11 = vpop.permute.xlu1 %374 }
  0xc4   : > { %v358_v61 = vmul.f32 %v350_v60, %v338_v59 }
  0xc6   : > { %v1849_v62 = vadd.f32 %v358_v61, %v333_v53  ;;  %440 = vperm.xlu1 %1436, %v1804_v9   ;;  %v276_v53 = vmul.f32 %v1838_v48, %v252_v40  ;;  %v1952_v48 = vld [vmem:[#allocation5 + $0x30] sm:$0xff]  ;;  %v423_v40 = vld [vmem:[#allocation2 + $0xc0] sm:$0xff] }
  0xc7   : > { %599 = vmatpush.msra.mxu0 %v1952_v48  ;;  %655 = vmatpush.msra.mxu1 %v1952_v48 }
  0xc8   : > { %v305_v10 = vadd.f32 %v301_v44, %v276_v53  ;;  %794 = vmatpush.msra.mxu2 %v1952_v48  ;;  %850 = vmatpush.msra.mxu3 %v1952_v48  ;;  %v367_v53 = vld [vmem:[#allocation2 + $0x90] sm:$0xff] }
  0xc9   : > { %600 = vmatpush.msra.mxu0 %v1965_v24  ;;  %656 = vmatpush.msra.mxu1 %v1965_v24 }
  0xca   : > { %795 = vmatpush.msra.mxu2 %v1965_v24  ;;  %851 = vmatpush.msra.mxu3 %v1965_v24 }
  0xcb   : > { %601 = vmatpush.msra.mxu0 %v1977_v35  ;;  %657 = vmatpush.msra.mxu1 %v1977_v35 }
  0xcc   : > { %428 = vperm.xlu2 %1435, %v1799_v8   ;;  %v1862_v8 = vpop.permute.xlu2 %370  ;;  %v1864_v14 = vpop.permute.xlu1 %399  ;;  %796 = vmatpush.msra.mxu2 %v1977_v35 }
  0xcd   : > { %v385_v1 = vmul.f32 %v1862_v8, %v365_v49  ;;  %v414_v8 = vmul.f32 %v1864_v14, %v394_v55  ;;  %v1989_v49 = vld [vmem:[#allocation5 + $0x18] sm:$0xff]  ;;  %852 = vmatpush.msra.mxu3 %v1977_v35 }
  0xce   : > { %1440 = vset.pattern.permute.xlu1 %v1664_v57  ;;  %602 = vmatpush.msra.mxu0 %v1989_v49 }
  0xcf   : > { %469 = vperm.xlu1 %1440, %v1804_v9   ;;  %v389_v14 = vadd.f32 %v385_v1, %v360_v0  ;;  %658 = vmatpush.msra.mxu1 %v1989_v49 }
  0xd0   : > { %797 = vmatpush.msra.mxu2 %v1989_v49  ;;  %853 = vmatpush.msra.mxu3 %v1989_v49 }
  0xd1   : > { %v418_v44 = vadd.f32 %v414_v8, %v389_v14 }
  0xd4   : > { %1437 = vset.pattern.permute.xlu2 %v1662_v13  ;;  %v1866_v13 = vpop.permute.xlu2 %378 }
  0xd5   : > { %411 = vperm.xlu2 %1437, %v1804_v9   ;;  %v1868_v9 = vpop.permute.xlu0 %324  ;;  %v1870_v15 = vpop.permute.xlu1 %382 }
  0xd6   : > { %v330_v63 = vmul.f32 %v1868_v9, %v310_v46  ;;  %v386_v9 = vmul.f32 %v1860_v11, %v366_v54  ;;  %v368_v54 = vld [vmem:[#allocation2 + $0x98] sm:$0xff] }
  0xd8   : > { %v334_v11 = vadd.f32 %v330_v63, %v305_v10  ;;  %v390_v42 = vadd.f32 %v386_v9, %v1846_v58  ;;  %v424_v58 = vld [vmem:[#allocation2 + $0xc8] sm:$0xff]  ;;  %v452_v9 = vld [vmem:[#allocation2 + $0xe0] sm:$0xff] }
  0xdd   : > { %1439 = vset.pattern.permute.xlu2 %v1664_v57 }
  0xde   : > { %461 = vperm.xlu2 %1439, %v1778_v4   ;;  %v1872_v4 = vpop.permute.xlu2 %403  ;;  %v1880_v20 = vpop.permute.xlu1 %432 }
  0xe6   : > { %465 = vperm.xlu2 %1439, %v1796_v7   ;;  %v1874_v7 = vpop.permute.xlu0 %353 }
  0xe7   : > { %v359_v23 = vmul.f32 %v1874_v7, %v339_v56  ;;  %v395_v7 = vld [vmem:[#allocation2 + $0xa8] sm:$0xff] }
  0xe8   : > { %v415_v55 = vmul.f32 %v1872_v4, %v395_v7  ;;  %v2003_v4 = vld [vmem:[#allocation5 + $0x10] sm:$0xff] }
  0xe9   : > { %v363_v46 = vadd.f32 %v359_v23, %v334_v11  ;;  %v388_v23 = vmul.f32 %v1870_v15, %v368_v54  ;;  %v444_v15 = vmul.f32 %v1880_v20, %v424_v58  ;;  %603 = vmatpush.msra.mxu0 %v2003_v4  ;;  %659 = vmatpush.msra.mxu1 %v2003_v4  ;;  %v396_v58 = vld [vmem:[#allocation2 + $0xb0] sm:$0xff] }
  0xea   : > { %798 = vmatpush.msra.mxu2 %v2003_v4  ;;  %854 = vmatpush.msra.mxu3 %v2003_v4 }
 0x110   : > { %v1901_v27 = vpop.xlane.xlu0 %512 }
 0x111   : > { %vm551_vm9 = vweird.f32 %v1901_v27 }
 0x118   : > { %v1914_v34 = vpop.xlane.xlu1 %514 }
 0x119   : > { %vm566_vm12 = vweird.f32 %v1914_v34 }
 0x11f   : > { %v1876_v16 = vpop.xlane.xlu2 %508 }
 0x120   : > { %1449 = vrcp.f32 %v1876_v16  ;;  %vm521_vm2 = vweird.f32 %v1876_v16  ;;  %v525_v10 = vand.u32 2147483647, %v1876_v16 }
 0x122   : > { %vm526_vm6 = vcmp.eq.f32.partialorder %v525_v10, 8.507059e+37 }
 0x123   : > { %v1956_v18 = vpop.permute.xlu0 %407 }
 0x126   : > { %v1907_v29 = vpop.eup %1449 }
 0x127   : > { %v1903_v28 = vpop.xlane.xlu2 %510  ;;  %v517_v39 = vmul.f32 %v1907_v29, %v1876_v16  ;;  %vm522_vm0 = vweird.f32 %v1907_v29 }
 0x128   : > { %1451 = vrcp.f32 %v1903_v28  ;;  %vm2016_vm3 = vmor %vm521_vm2, %vm522_vm0  ;;  %vm536_vm4 = vweird.f32 %v1903_v28 }
 0x129   : > { %1453 = vrcp.f32 %v1901_v27  ;;  %v518_v57 = vsub.f32 1.0, %v517_v39 }
 0x12a   : > { %1455 = vrcp.f32 %v1914_v34 }
 0x12b   : > { %v519_v30 = vmul.f32 %v1907_v29, %v518_v57 }
 0x12c   : > { %v458_v8 = vpop.permute.xlu0 %457 }
 0x12d   : > { %v520_v57 = vadd.f32 %v1907_v29, %v519_v30  ;;  %v2022_v30 = vld [vmem:[#allocation5 + $0x8] sm:$0xff] }
 0x12e   : > { %v1937_v51 = vpop.eup %1451  ;;  %604 = vmatpush.msra.mxu0 %v2022_v30  ;;  %660 = vmatpush.msra.mxu1 %v2022_v30 }
 0x12f   : > { %v532_v59 = vmul.f32 %v1937_v51, %v1903_v28  ;;  %v429_v60 = vpop.permute.xlu2 %428  ;;  %v1948_v61 = vpop.eup %1453  ;;  %vm537_vm1 = vweird.f32 %v1937_v51  ;;  %v524_v14 = vsel %vm2016_vm3, %v1907_v29, %v520_v57  ;;  %v419_v29 = vadd.f32 %v415_v55, %v390_v42  ;;  %799 = vmatpush.msra.mxu2 %v2022_v30  ;;  %855 = vmatpush.msra.mxu3 %v2022_v30 }
 0x130   : > { %v1960_v19 = vpop.eup %1455  ;;  %v547_v25 = vmul.f32 %v1948_v61, %v1901_v27  ;;  %v1972_v31 = vpop.permute.xlu1 %436  ;;  %v443_v0 = vmul.f32 %v429_v60, %v423_v40  ;;  %v387_v60 = vmul.f32 %v1866_v13, %v367_v53  ;;  %v505_v13 = vmul.f32 16.0, %v1841_v50  ;;  %vm2034_vm5 = vmor %vm536_vm4, %vm537_vm1  ;;  %v2043_v40 = vld [vmem:[#allocation5] sm:$0xff] }
 0x131   : > { %v533_v12 = vsub.f32 1.0, %v532_v59  ;;  %v562_v39 = vmul.f32 %v1960_v19, %v1914_v34  ;;  %v527_v59 = vand.u32 2147483648, %v1876_v16  ;;  %v540_v16 = vand.u32 2147483647, %v1903_v28  ;;  %605 = vmatpush.msra.mxu0 %v2043_v40  ;;  %661 = vmatpush.msra.mxu1 %v2043_v40 }
 0x132   : > { %v548_v56 = vsub.f32 1.0, %v547_v25  ;;  %v448_v42 = vadd.f32 %v444_v15, %v419_v29  ;;  %vm552_vm8 = vweird.f32 %v1948_v61  ;;  %800 = vmatpush.msra.mxu2 %v2043_v40  ;;  %856 = vmatpush.msra.mxu3 %v2043_v40  ;;  %vm567_vm10 = vweird.f32 %v1960_v19 }
 0x133   : > { %v534_v33 = vmul.f32 %v1937_v51, %v533_v12  ;;  %v563_v1 = vsub.f32 1.0, %v562_v39  ;;  %v542_v12 = vand.u32 2147483648, %v1903_v28  ;;  %v528_v50 = vor.u32 1.1754944e-38, %v527_v59  ;;  %980 = vmatpush.msrb.mxu0 %v1878_v17  ;;  %vm2071_vm11 = vmor %vm551_vm9, %vm552_vm8  ;;  %1036 = vmatpush.msrb.mxu1 %v1878_v17 }
 0x134   : > { %v549_v11 = vmul.f32 %v1948_v61, %v548_v56  ;;  %v472_v39 = vmul.f32 %v458_v8, %v452_v9  ;;  %v453_v56 = vld [vmem:[#allocation2 + $0xe8] sm:$0xff]  ;;  %vm541_vm7 = vcmp.eq.f32.partialorder %v540_v16, 8.507059e+37  ;;  %v416_v8 = vmul.f32 %v1956_v18, %v396_v58  ;;  %1330 = vmatpush.msrb.mxu3 %v1878_v17  ;;  %1175 = vmatpush.msrb.mxu2 %v1878_v17  ;;  %vm2091_vm13 = vmor %vm566_vm12, %vm567_vm10 }
 0x135   : > { %v535_v63 = vadd.f32 %v1937_v51, %v534_v33  ;;  %v447_v33 = vadd.f32 %v443_v0, %v418_v44  ;;  %v564_v53 = vmul.f32 %v1960_v19, %v563_v1  ;;  %v543_v54 = vor.u32 1.1754944e-38, %v542_v12  ;;  %v425_v1 = vld [vmem:[#allocation2 + $0xd0] sm:$0xff]  ;;  %981 = vmatpush.msrb.mxu0 %v1885_v21  ;;  %1037 = vmatpush.msrb.mxu1 %v1885_v21 }
 0x136   : > { %v392_v44 = vadd.f32 %v388_v23, %v363_v46  ;;  %v529_v57 = vsel %vm526_vm6, %v528_v50, %v524_v14  ;;  %v550_v55 = vadd.f32 %v1948_v61, %v549_v11  ;;  %v555_v25 = vand.u32 2147483647, %v1901_v27  ;;  %1331 = vmatpush.msrb.mxu3 %v1885_v21  ;;  %1176 = vmatpush.msrb.mxu2 %v1885_v21 }
 0x137   : > { %v1996_v47 = vpop.permute.xlu2 %411  ;;  %v539_v20 = vsel %vm2034_vm5, %v1937_v51, %v535_v63  ;;  %v391_v51 = vadd.f32 %v387_v60, %v1849_v62  ;;  %v397_v63 = vld [vmem:[#allocation2 + $0xb8] sm:$0xff]  ;;  %v557_v62 = vand.u32 2147483648, %v1901_v27  ;;  %v2059_v46 = vadd.f32 %v472_v39, %v447_v33  ;;  %v454_v39 = vld [vmem:[#allocation2 + $0xf0] sm:$0xff]  ;;  %982 = vmatpush.msrb.mxu0 %v1887_v22  ;;  %1038 = vmatpush.msrb.mxu1 %v1887_v22 }
 0x138   : > { %v441_v7 = vpop.permute.xlu1 %440  ;;  %v544_v59 = vsel %vm541_vm7, %v543_v54, %v539_v20  ;;  %v565_v12 = vadd.f32 %v1960_v19, %v564_v53  ;;  %v530_v9 = vmul.f32 %v529_v57, %v1986_v41  ;;  %v426_v60 = vld [vmem:[#allocation2 + $0xd8] sm:$0xff]  ;;  %v417_v15 = vmul.f32 %v1996_v47, %v397_v63  ;;  %1332 = vmatpush.msrb.mxu3 %v1887_v22 }
 0x139   : > { %v545_v16 = vmul.f32 %v544_v59, %v505_v13  ;;  %v554_v18 = vsel %vm2071_vm11, %v1948_v61, %v550_v55  ;;  %v572_v41 = vand.u32 2147483648, %v1914_v34  ;;  %v445_v14 = vmul.f32 %v1972_v31, %v425_v1  ;;  %v455_v27 = vld [vmem:[#allocation2 + $0xf8] sm:$0xff]  ;;  %1177 = vmatpush.msrb.mxu2 %v1887_v22  ;;  %983 = vmatpush.msrb.mxu0 %v1897_v26 }
 0x13a   : > { %v570_v17 = vand.u32 2147483647, %v1914_v34  ;;  %v446_v61 = vmul.f32 %v441_v7, %v426_v60  ;;  %v576_v28 = vmul.f32 %v530_v9, %v2059_v46  ;;  %v558_v31 = vor.u32 1.1754944e-38, %v557_v62  ;;  %1333 = vmatpush.msrb.mxu3 %v1897_v26  ;;  %1039 = vmatpush.msrb.mxu1 %v1897_v26 }
 0x13b   : > { %v569_v20 = vsel %vm2091_vm13, %v1960_v19, %v565_v12  ;;  %v420_v33 = vadd.f32 %v416_v8, %v391_v51  ;;  %vm556_vm14 = vcmp.eq.f32.partialorder %v555_v25, 8.507059e+37  ;;  %v421_v34 = vadd.f32 %v417_v15, %v392_v44  ;;  %1178 = vmatpush.msrb.mxu2 %v1897_v26  ;;  %984 = vmatpush.msrb.mxu0 %v1910_v32 }
 0x13c   : > { %v506_v21 = vmul.f32 16.0, %v1829_v37  ;;  %v559_v53 = vsel %vm556_vm14, %v558_v31, %v554_v18  ;;  %v573_v54 = vor.u32 1.1754944e-38, %v572_v41  ;;  %vm571_vm15 = vcmp.eq.f32.partialorder %v570_v17, 8.507059e+37  ;;  %1334 = vmatpush.msrb.mxu3 %v1910_v32  ;;  %1040 = vmatpush.msrb.mxu1 %v1910_v32 }
 0x13d   : > { %v449_v19 = vadd.f32 %v445_v14, %v420_v33  ;;  %v450_v51 = vadd.f32 %v446_v61, %v421_v34  ;;  %v507_v37 = vmul.f32 16.0, %v1833_v45  ;;  %1179 = vmatpush.msrb.mxu2 %v1910_v32  ;;  %985 = vmatpush.msrb.mxu0 %v1919_v36 }
 0x13e   : > { %v574_v44 = vsel %vm571_vm15, %v573_v54, %v569_v20  ;;  %v560_v22 = vmul.f32 %v559_v53, %v506_v21  ;;  %1335 = vmatpush.msrb.mxu3 %v1919_v36  ;;  %1041 = vmatpush.msrb.mxu1 %v1919_v36 }
 0x13f   : > { %v462_v0 = vpop.permute.xlu2 %461  ;;  %v575_v26 = vmul.f32 %v574_v44, %v507_v37  ;;  %1180 = vmatpush.msrb.mxu2 %v1919_v36  ;;  %986 = vmatpush.msrb.mxu0 %v1921_v38 }
 0x140   : > { %v473_v10 = vmul.f32 %v462_v0, %v453_v56  ;;  %1336 = vmatpush.msrb.mxu3 %v1921_v38  ;;  %1042 = vmatpush.msrb.mxu1 %v1921_v38 }
 0x141   : > { %v470_v13 = vpop.permute.xlu1 %469  ;;  %1181 = vmatpush.msrb.mxu2 %v1921_v38  ;;  %987 = vmatpush.msrb.mxu0 %v1930_v43 }
 0x142   : > { %v2077_v11 = vadd.f32 %v473_v10, %v448_v42  ;;  %v475_v7 = vmul.f32 %v470_v13, %v455_v27  ;;  %1337 = vmatpush.msrb.mxu3 %v1930_v43  ;;  %1043 = vmatpush.msrb.mxu1 %v1930_v43 }
 0x143   : > { %1182 = vmatpush.msrb.mxu2 %v1930_v43  ;;  %988 = vmatpush.msrb.mxu0 %v1939_v52 }
 0x144   : > { %v577_v50 = vmul.f32 %v545_v16, %v2077_v11  ;;  %v2115_v58 = vadd.f32 %v475_v7, %v450_v51  ;;  %1338 = vmatpush.msrb.mxu3 %v1939_v52  ;;  %1044 = vmatpush.msrb.mxu1 %v1939_v52 }
 0x145   : > { %1183 = vmatpush.msrb.mxu2 %v1939_v52  ;;  %989 = vmatpush.msrb.mxu0 %v1952_v48 }
 0x146   : > { %v580_v29 = vadd.f32 %v577_v50, %v576_v28  ;;  %v579_v45 = vmul.f32 %v575_v26, %v2115_v58  ;;  %1339 = vmatpush.msrb.mxu3 %v1952_v48  ;;  %1045 = vmatpush.msrb.mxu1 %v1952_v48 }
 0x147   : > { %v466_v56 = vpop.permute.xlu2 %465  ;;  %1184 = vmatpush.msrb.mxu2 %v1952_v48  ;;  %990 = vmatpush.msrb.mxu0 %v1965_v24 }
 0x148   : > { %v474_v57 = vmul.f32 %v466_v56, %v454_v39  ;;  %1340 = vmatpush.msrb.mxu3 %v1965_v24  ;;  %1046 = vmatpush.msrb.mxu1 %v1965_v24 }
 0x149   : > { %1185 = vmatpush.msrb.mxu2 %v1965_v24  ;;  %991 = vmatpush.msrb.mxu0 %v1977_v35 }
 0x14a   : > { %v2117_v42 = vadd.f32 %v474_v57, %v449_v19  ;;  %1341 = vmatpush.msrb.mxu3 %v1977_v35  ;;  %1047 = vmatpush.msrb.mxu1 %v1977_v35 }
 0x14b   : > { %1186 = vmatpush.msrb.mxu2 %v1977_v35  ;;  %992 = vmatpush.msrb.mxu0 %v1989_v49 }
 0x14c   : > { %v578_v55 = vmul.f32 %v560_v22, %v2117_v42  ;;  %1342 = vmatpush.msrb.mxu3 %v1989_v49  ;;  %1048 = vmatpush.msrb.mxu1 %v1989_v49 }
 0x14d   : > { %1187 = vmatpush.msrb.mxu2 %v1989_v49  ;;  %993 = vmatpush.msrb.mxu0 %v2003_v4 }
 0x14e   : > { %v581_v59 = vadd.f32 %v580_v29, %v578_v55  ;;  %1343 = vmatpush.msrb.mxu3 %v2003_v4  ;;  %1049 = vmatpush.msrb.mxu1 %v2003_v4 }
 0x14f   : > { %1188 = vmatpush.msrb.mxu2 %v2003_v4  ;;  %994 = vmatpush.msrb.mxu0 %v2022_v30 }
 0x150   : > { %v582_v32 = vadd.f32 %v581_v59, %v579_v45  ;;  %1344 = vmatpush.msrb.mxu3 %v2022_v30  ;;  %1050 = vmatpush.msrb.mxu1 %v2022_v30 }
 0x151   : > { %1189 = vmatpush.msrb.mxu2 %v2022_v30  ;;  %995 = vmatpush.msrb.mxu0 %v2043_v40 }
 0x152   : > { %v583_v36 = vrot.slane %v582_v32, 4  ;;  %1345 = vmatpush.msrb.mxu3 %v2043_v40  ;;  %1051 = vmatpush.msrb.mxu1 %v2043_v40 }
 0x153   : > { %1190 = vmatpush.msrb.mxu2 %v2043_v40 }
 0x154   : > { %v584_v38 = vadd.f32 %v583_v36, %v582_v32 }
 0x156   : > { %v585_v43 = vrot.slane %v584_v38, 2 }
 0x158   : > { %v586_v52 = vadd.f32 %v585_v43, %v584_v38 }
 0x15a   : > { %v587_v48 = vrot.slane %v586_v52, 1 }
 0x15c   : > { %v588_v24 = vadd.f32 %v587_v48, %v586_v52 }
 0x15e   : > { %v589_v35 = vmul.f32 %v588_v24, %v588_v24 }
 0x160   : > { %606 = vmatmul.f32.vlgmr.msra.gmra.mxu0 %v589_v35 }
 0x1dd   : > { %v607_v49 = vpop.f32.mrf.mxu0 }
 0x1de   : > { %1457 = vrsqrt.f32 %v607_v49  ;;  %vm617_vm0 = vcmp.eq.f32.partialorder %v607_v49, inf  ;;  %v620_v30 = vand.u32 2147483648, %v607_v49  ;;  %vm619_vm1 = vcmp.eq.f32.partialorder %v607_v49, 0.0 }
 0x1df   : > { %v622_v60 = vadd.f32 1.0, %v607_v49 }
 0x1e4   : > { %v1458_v4 = vpop.eup %1457 }
 0x1e5   : > { %v611_v63 = vmul.f32 %v1458_v4, %v607_v49 }
 0x1e7   : > { %v612_v0 = vmul.f32 %v1458_v4, %v611_v63 }
 0x1e9   : > { %v613_v62 = vmul.f32 0.5, %v612_v0 }
 0x1eb   : > { %v614_v1 = vsub.f32 1.5, %v613_v62 }
 0x1ed   : > { %v615_v10 = vmul.f32 %v1458_v4, %v614_v1 }
 0x1ef   : > { %v616_v12 = vmul.f32 %v615_v10, %v607_v49 }
 0x1f1   : > { %v618_v9 = vsel %vm617_vm0, %v607_v49, %v616_v12 }
 0x1f2   : > { %v621_v8 = vsel %vm619_vm1, %v620_v30, %v618_v9 }
 0x1f3   : > { %v623_v23 = vadd.f32 1e-20, %v621_v8 }
 0x1f5   : > { %v624_v25 = vmul.f32 %v623_v23, %v622_v60 }
 0x1f7   : > { %1459 = vrcp.f32 %v624_v25  ;;  %v636_v18 = vand.u32 2147483648, %v624_v25  ;;  %v634_v14 = vand.u32 2147483647, %v624_v25  ;;  %vm630_vm3 = vweird.f32 %v624_v25 }
 0x1f9   : > { %v637_v47 = vor.u32 1.1754944e-38, %v636_v18  ;;  %vm635_vm5 = vcmp.eq.f32.partialorder %v634_v14, 8.507059e+37 }
 0x1fd   : > { %v1460_v16 = vpop.eup %1459 }
 0x1fe   : > { %v626_v40 = vmul.f32 %v1460_v16, %v624_v25  ;;  %vm631_vm2 = vweird.f32 %v1460_v16 }
 0x1ff   : > { %vm632_vm4 = vmor %vm630_vm3, %vm631_vm2 }
 0x200   : > { %v627_v15 = vsub.f32 1.0, %v626_v40 }
 0x202   : > { %v628_v41 = vmul.f32 %v1460_v16, %v627_v15 }
 0x204   : > { %v629_v27 = vadd.f32 %v1460_v16, %v628_v41 }
 0x206   : > { %v633_v17 = vsel %vm632_vm4, %v1460_v16, %v629_v27 }
 0x207   : > { %v638_v61 = vsel %vm635_vm5, %v637_v47, %v633_v17 }
 0x208   : > { %v639_v13 = vmul.f32 %v638_v61, %v607_v49 }
 0x20a   : > { %v640_v28 = vmul.f32 %v639_v13, %v588_v24 }
 0x20c   : > { %v641_v50 = vperm.slane %v640_v28, 0 }
 0x20e   : > { %v642_v31 = vmul.f32 %v641_v50, %v2059_v46  ;;  %v643_v20 = vmul.f32 %v641_v50, %v2077_v11  ;;  %v644_v33 = vmul.f32 %v641_v50, %v2117_v42  ;;  %v645_v39 = vmul.f32 %v641_v50, %v2115_v58 }
 0x210   : > { %662 = vmatmul.f32.vlgmr.msra.gmra.mxu1 %v642_v31 }
 0x218   : > { %665 = vmatmul.f32.gmra.mxu1 %v643_v20 }
 0x220   : > { %668 = vmatmul.f32.gmra.mxu1 %v644_v33 }
 0x228   : > { %671 = vmatmul.f32.gmra.mxu1 %v645_v39 }
 0x28d   : > { %v663_v34 = vpop.f32.mrf.mxu1 }
 0x28e   : > { %v2172_v7 = vadd.f32 %v663_v34, %v1776_v3 }
 0x290   : > { %679 = vmax.xlane.f32.xlu0 %v2172_v7 }
 0x295   : > { %v666_v29 = vpop.f32.mrf.mxu1 }
 0x296   : > { %v2176_v21 = vadd.f32 %v666_v29, %v1791_v6 }
 0x298   : > { %681 = vmax.xlane.f32.xlu2 %v2176_v21 }
 0x29d   : > { %v669_v53 = vpop.f32.mrf.mxu1 }
 0x29e   : > { %v2180_v54 = vadd.f32 %v669_v53, %v1771_v2 }
 0x2a0   : > { %683 = vmax.xlane.f32.xlu1 %v2180_v54 }
 0x2a5   : > { %v672_v56 = vpop.f32.mrf.mxu1 }
 0x2a6   : > { %v2184_v19 = vadd.f32 %v672_v56, %v1786_v5 }
 0x2a8   : > { %685 = vmax.xlane.f32.xlu2 %v2184_v19 }
 0x303   : > { %v680_v3 = vpop.xlane.xlu0 %679 }
 0x304   : > { %v687_v51 = vsub.f32 %v2172_v7, %v680_v3 }
 0x306   : > { %v691_v57 = vmul.f32 1.442695, %v687_v51 }
 0x308   : > { %1461 = vpow2.f32 %v691_v57 }
 0x30b   : > { %v682_v6 = vpop.xlane.xlu2 %681 }
 0x30c   : > { %v688_v44 = vsub.f32 %v2176_v21, %v682_v6 }
 0x30e   : > { %v1462_v37 = vpop.eup %1461  ;;  %v693_v22 = vmul.f32 1.442695, %v688_v44 }
 0x30f   : > { %703 = vadd.xlane.f32.xlu0 %v1462_v37  ;;  %v699_v16 = vmul.f32 16.0, %v1462_v37 }
 0x310   : > { %1463 = vpow2.f32 %v693_v22 }
 0x313   : > { %v684_v2 = vpop.xlane.xlu1 %683 }
 0x314   : > { %v689_v26 = vsub.f32 %v2180_v54, %v684_v2 }
 0x316   : > { %v1464_v55 = vpop.eup %1463  ;;  %v695_v5 = vmul.f32 1.442695, %v689_v26 }
 0x317   : > { %705 = vadd.xlane.f32.xlu1 %v1464_v55  ;;  %v700_v18 = vmul.f32 16.0, %v1464_v55 }
 0x318   : > { %1465 = vpow2.f32 %v695_v5 }
 0x31b   : > { %v686_v45 = vpop.xlane.xlu2 %685 }
 0x31c   : > { %v690_v59 = vsub.f32 %v2184_v19, %v686_v45 }
 0x31e   : > { %v1466_v32 = vpop.eup %1465  ;;  %v697_v36 = vmul.f32 1.442695, %v690_v59 }
 0x31f   : > { %707 = vadd.xlane.f32.xlu2 %v1466_v32  ;;  %v701_v3 = vmul.f32 16.0, %v1466_v32 }
 0x320   : > { %1467 = vpow2.f32 %v697_v36 }
 0x326   : > { %v2191_v38 = vpop.eup %1467 }
 0x327   : > { %709 = vadd.xlane.f32.xlu0 %v2191_v38  ;;  %v702_v36 = vmul.f32 16.0, %v2191_v38 }
 0x382   : > { %v704_v43 = vpop.xlane.xlu0 %703 }
 0x383   : > { %1469 = vrcp.f32 %v704_v43  ;;  %v722_v0 = vand.u32 2147483648, %v704_v43  ;;  %vm716_vm7 = vweird.f32 %v704_v43  ;;  %v720_v62 = vand.u32 2147483647, %v704_v43 }
 0x385   : > { %v723_v9 = vor.u32 1.1754944e-38, %v722_v0  ;;  %vm721_vm9 = vcmp.eq.f32.partialorder %v720_v62, 8.507059e+37 }
 0x389   : > { %v1470_v52 = vpop.eup %1469 }
 0x38a   : > { %v712_v48 = vmul.f32 %v1470_v52, %v704_v43  ;;  %v706_v24 = vpop.xlane.xlu1 %705  ;;  %vm717_vm6 = vweird.f32 %v1470_v52 }
 0x38b   : > { %1471 = vrcp.f32 %v706_v24  ;;  %vm718_vm8 = vmor %vm716_vm7, %vm717_vm6  ;;  %v737_v8 = vand.u32 2147483648, %v706_v24  ;;  %v735_v23 = vand.u32 2147483647, %v706_v24  ;;  %vm731_vm11 = vweird.f32 %v706_v24 }
 0x38c   : > { %v713_v35 = vsub.f32 1.0, %v712_v48 }
 0x38d   : > { %v738_v41 = vor.u32 1.1754944e-38, %v737_v8  ;;  %vm736_vm13 = vcmp.eq.f32.partialorder %v735_v23, 8.507059e+37 }
 0x38e   : > { %v714_v49 = vmul.f32 %v1470_v52, %v713_v35 }
 0x390   : > { %v715_v4 = vadd.f32 %v1470_v52, %v714_v49 }
 0x391   : > { %v1472_v63 = vpop.eup %1471 }
 0x392   : > { %v727_v1 = vmul.f32 %v1472_v63, %v706_v24  ;;  %v708_v10 = vpop.xlane.xlu2 %707  ;;  %v719_v12 = vsel %vm718_vm8, %v1470_v52, %v715_v4  ;;  %vm732_vm10 = vweird.f32 %v1472_v63 }
 0x393   : > { %1473 = vrcp.f32 %v708_v10  ;;  %v724_v25 = vsel %vm721_vm9, %v723_v9, %v719_v12  ;;  %vm733_vm12 = vmor %vm731_vm11, %vm732_vm10  ;;  %v750_v50 = vand.u32 2147483647, %v708_v10  ;;  %v752_v31 = vand.u32 2147483648, %v708_v10 }
 0x394   : > { %v728_v30 = vsub.f32 1.0, %v727_v1  ;;  %v725_v14 = vmul.f32 %v724_v25, %v699_v16  ;;  %vm746_vm15 = vweird.f32 %v708_v10 }
 0x395   : > { %v753_v56 = vor.u32 1.1754944e-38, %v752_v31  ;;  %vm751_vm1 = vcmp.eq.f32.partialorder %v750_v50, 8.507059e+37 }
 0x396   : > { %v729_v60 = vmul.f32 %v1472_v63, %v728_v30  ;;  %v771_v20 = vmul.f32 %v725_v14, %v2059_v46 }
 0x398   : > { %v730_v40 = vadd.f32 %v1472_v63, %v729_v60 }
 0x399   : > { %v1474_v15 = vpop.eup %1473 }
 0x39a   : > { %v734_v27 = vsel %vm733_vm12, %v1472_v63, %v730_v40  ;;  %v742_v47 = vmul.f32 %v1474_v15, %v708_v10  ;;  %v710_v17 = vpop.xlane.xlu0 %709  ;;  %vm747_vm14 = vweird.f32 %v1474_v15 }
 0x39b   : > { %v739_v61 = vsel %vm736_vm13, %v738_v41, %v734_v27  ;;  %1475 = vrcp.f32 %v710_v17  ;;  %vm748_vm0 = vmor %vm746_vm15, %vm747_vm14  ;;  %v767_v22 = vand.u32 2147483648, %v710_v17  ;;  %v765_v26 = vand.u32 2147483647, %v710_v17 }
 0x39c   : > { %v740_v13 = vmul.f32 %v739_v61, %v700_v18  ;;  %v743_v28 = vsub.f32 1.0, %v742_v47  ;;  %vm761_vm3 = vweird.f32 %v710_v17 }
 0x39d   : > { %v768_v59 = vor.u32 1.1754944e-38, %v767_v22  ;;  %vm766_vm5 = vcmp.eq.f32.partialorder %v765_v26, 8.507059e+37 }
 0x39e   : > { %v772_v33 = vmul.f32 %v740_v13, %v2077_v11  ;;  %v744_v39 = vmul.f32 %v1474_v15, %v743_v28 }
 0x3a0   : > { %v745_v34 = vadd.f32 %v1474_v15, %v744_v39  ;;  %v775_v29 = vadd.f32 %v772_v33, %v771_v20 }
 0x3a1   : > { %v1476_v53 = vpop.eup %1475 }
 0x3a2   : > { %v749_v51 = vsel %vm748_vm0, %v1474_v15, %v745_v34  ;;  %v757_v57 = vmul.f32 %v1476_v53, %v710_v17  ;;  %vm762_vm2 = vweird.f32 %v1476_v53 }
 0x3a3   : > { %v754_v6 = vsel %vm751_vm1, %v753_v56, %v749_v51  ;;  %vm763_vm4 = vmor %vm761_vm3, %vm762_vm2 }
 0x3a4   : > { %v755_v44 = vmul.f32 %v754_v6, %v701_v3  ;;  %v758_v37 = vsub.f32 1.0, %v757_v57 }
 0x3a6   : > { %v759_v2 = vmul.f32 %v1476_v53, %v758_v37  ;;  %v773_v55 = vmul.f32 %v755_v44, %v2117_v42 }
 0x3a8   : > { %v760_v5 = vadd.f32 %v1476_v53, %v759_v2  ;;  %v776_v45 = vadd.f32 %v775_v29, %v773_v55 }
 0x3aa   : > { %v764_v32 = vsel %vm763_vm4, %v1476_v53, %v760_v5 }
 0x3ab   : > { %v769_v43 = vsel %vm766_vm5, %v768_v59, %v764_v32 }
 0x3ac   : > { %v770_v52 = vmul.f32 %v769_v43, %v702_v36 }
 0x3ae   : > { %v774_v48 = vmul.f32 %v770_v52, %v2115_v58 }
 0x3b0   : > { %v777_v24 = vadd.f32 %v776_v45, %v774_v48 }
 0x3b2   : > { %v778_v35 = vrot.slane %v777_v24, 4 }
 0x3b4   : > { %v779_v49 = vadd.f32 %v778_v35, %v777_v24 }
 0x3b6   : > { %v780_v4 = vrot.slane %v779_v49, 2 }
 0x3b8   : > { %v781_v63 = vadd.f32 %v780_v4, %v779_v49 }
 0x3ba   : > { %v782_v0 = vrot.slane %v781_v63, 1 }
 0x3bc   : > { %v783_v62 = vadd.f32 %v782_v0, %v781_v63 }
 0x3be   : > { %v784_v1 = vmul.f32 %v783_v62, %v783_v62 }
 0x3c0   : > { %801 = vmatmul.f32.vlgmr.msra.gmra.mxu2 %v784_v1 }
 0x443   : > { %v802_v10 = vpop.f32.mrf.mxu2 }
 0x444   : > { %1477 = vrsqrt.f32 %v802_v10  ;;  %vm812_vm6 = vcmp.eq.f32.partialorder %v802_v10, inf  ;;  %v815_v25 = vand.u32 2147483648, %v802_v10  ;;  %vm814_vm7 = vcmp.eq.f32.partialorder %v802_v10, 0.0 }
 0x445   : > { %v817_v15 = vadd.f32 1.0, %v802_v10 }
 0x44a   : > { %v1478_v12 = vpop.eup %1477 }
 0x44b   : > { %v806_v30 = vmul.f32 %v1478_v12, %v802_v10 }
 0x44d   : > { %v807_v38 = vmul.f32 %v1478_v12, %v806_v30 }
 0x44f   : > { %v808_v9 = vmul.f32 0.5, %v807_v38 }
 0x451   : > { %v809_v8 = vsub.f32 1.5, %v808_v9 }
 0x453   : > { %v810_v60 = vmul.f32 %v1478_v12, %v809_v8 }
 0x455   : > { %v811_v23 = vmul.f32 %v810_v60, %v802_v10 }
 0x457   : > { %v813_v16 = vsel %vm812_vm6, %v802_v10, %v811_v23 }
 0x458   : > { %v816_v40 = vsel %vm814_vm7, %v815_v25, %v813_v16 }
 0x459   : > { %v818_v18 = vadd.f32 1e-20, %v816_v40 }
 0x45b   : > { %v819_v41 = vmul.f32 %v818_v18, %v817_v15 }
 0x45d   : > { %1479 = vrcp.f32 %v819_v41  ;;  %v831_v17 = vand.u32 2147483648, %v819_v41  ;;  %v829_v13 = vand.u32 2147483647, %v819_v41  ;;  %vm825_vm9 = vweird.f32 %v819_v41 }
 0x45f   : > { %v832_v50 = vor.u32 1.1754944e-38, %v831_v17  ;;  %vm830_vm11 = vcmp.eq.f32.partialorder %v829_v13, 8.507059e+37 }
 0x463   : > { %v1480_v14 = vpop.eup %1479 }
 0x464   : > { %v821_v27 = vmul.f32 %v1480_v14, %v819_v41  ;;  %vm826_vm8 = vweird.f32 %v1480_v14 }
 0x465   : > { %vm827_vm10 = vmor %vm825_vm9, %vm826_vm8 }
 0x466   : > { %v822_v47 = vsub.f32 1.0, %v821_v27 }
 0x468   : > { %v823_v61 = vmul.f32 %v1480_v14, %v822_v47 }
 0x46a   : > { %v824_v28 = vadd.f32 %v1480_v14, %v823_v61 }
 0x46c   : > { %v828_v31 = vsel %vm827_vm10, %v1480_v14, %v824_v28 }
 0x46d   : > { %v833_v20 = vsel %vm830_vm11, %v832_v50, %v828_v31 }
 0x46e   : > { %v834_v33 = vmul.f32 %v833_v20, %v802_v10 }
 0x470   : > { %v835_v39 = vmul.f32 %v834_v33, %v783_v62 }
 0x472   : > { %v836_v34 = vperm.slane %v835_v39, 0 }
 0x474   : > { %v837_v29 = vmul.f32 %v836_v34, %v2059_v46  ;;  %v838_v53 = vmul.f32 %v836_v34, %v2077_v11  ;;  %v839_v56 = vmul.f32 %v836_v34, %v2117_v42  ;;  %v840_v3 = vmul.f32 %v836_v34, %v2115_v58 }
 0x476   : > { %857 = vmatmul.f32.vlgmr.msra.gmra.mxu3 %v837_v29 }
 0x47e   : > { %860 = vmatmul.f32.gmra.mxu3 %v838_v53 }
 0x486   : > { %863 = vmatmul.f32.gmra.mxu3 %v839_v56 }
 0x48e   : > { %866 = vmatmul.f32.gmra.mxu3 %v840_v3 }
 0x4f9   : > { %v858_v51 = vpop.f32.mrf.mxu3 }
 0x4fa   : > { %v2204_v57 = vadd.f32 %v858_v51, %v2172_v7 }
 0x4fc   : > { %874 = vmax.xlane.f32.xlu1 %v2204_v57 }
 0x501   : > { %v861_v6 = vpop.f32.mrf.mxu3 }
 0x502   : > { %v2208_v44 = vadd.f32 %v861_v6, %v2176_v21 }
 0x504   : > { %876 = vmax.xlane.f32.xlu2 %v2208_v44 }
 0x509   : > { %v864_v37 = vpop.f32.mrf.mxu3 }
 0x50a   : > { %v2212_v22 = vadd.f32 %v864_v37, %v2180_v54 }
 0x50c   : > { %878 = vmax.xlane.f32.xlu0 %v2212_v22 }
 0x511   : > { %v867_v2 = vpop.f32.mrf.mxu3 }
 0x512   : > { %v2216_v26 = vadd.f32 %v867_v2, %v2184_v19 }
 0x514   : > { %880 = vmax.xlane.f32.xlu1 %v2216_v26 }
 0x56f   : > { %v875_v7 = vpop.xlane.xlu1 %874 }
 0x570   : > { %v882_v55 = vsub.f32 %v2204_v57, %v875_v7 }
 0x572   : > { %v886_v5 = vmul.f32 1.442695, %v882_v55 }
 0x574   : > { %1481 = vpow2.f32 %v886_v5 }
 0x577   : > { %v877_v21 = vpop.xlane.xlu2 %876 }
 0x578   : > { %v883_v45 = vsub.f32 %v2208_v44, %v877_v21 }
 0x57a   : > { %v1482_v59 = vpop.eup %1481  ;;  %v888_v36 = vmul.f32 1.442695, %v883_v45 }
 0x57b   : > { %898 = vadd.xlane.f32.xlu2 %v1482_v59  ;;  %v894_v14 = vmul.f32 16.0, %v1482_v59 }
 0x57c   : > { %1483 = vpow2.f32 %v888_v36 }
 0x57f   : > { %v879_v54 = vpop.xlane.xlu0 %878 }
 0x580   : > { %v884_v32 = vsub.f32 %v2212_v22, %v879_v54 }
 0x582   : > { %v1484_v43 = vpop.eup %1483  ;;  %v890_v19 = vmul.f32 1.442695, %v884_v32 }
 0x583   : > { %900 = vadd.xlane.f32.xlu0 %v1484_v43  ;;  %v895_v17 = vmul.f32 16.0, %v1484_v43 }
 0x584   : > { %1485 = vpow2.f32 %v890_v19 }
 0x587   : > { %v881_v52 = vpop.xlane.xlu1 %880 }
 0x588   : > { %v885_v48 = vsub.f32 %v2216_v26, %v881_v52 }
 0x58a   : > { %v1486_v24 = vpop.eup %1485  ;;  %v892_v35 = vmul.f32 1.442695, %v885_v48 }
 0x58b   : > { %902 = vadd.xlane.f32.xlu1 %v1486_v24  ;;  %v896_v7 = vmul.f32 16.0, %v1486_v24 }
 0x58c   : > { %1487 = vpow2.f32 %v892_v35 }
 0x592   : > { %v2223_v49 = vpop.eup %1487 }
 0x593   : > { %904 = vadd.xlane.f32.xlu2 %v2223_v49  ;;  %v897_v35 = vmul.f32 16.0, %v2223_v49 }
 0x5ee   : > { %v899_v4 = vpop.xlane.xlu2 %898 }
 0x5ef   : > { %1489 = vrcp.f32 %v899_v4  ;;  %v917_v38 = vand.u32 2147483648, %v899_v4  ;;  %vm911_vm13 = vweird.f32 %v899_v4  ;;  %v915_v9 = vand.u32 2147483647, %v899_v4 }
 0x5f1   : > { %v918_v16 = vor.u32 1.1754944e-38, %v917_v38  ;;  %vm916_vm15 = vcmp.eq.f32.partialorder %v915_v9, 8.507059e+37 }
 0x5f5   : > { %v1490_v63 = vpop.eup %1489 }
 0x5f6   : > { %v907_v0 = vmul.f32 %v1490_v63, %v899_v4  ;;  %v901_v62 = vpop.xlane.xlu0 %900  ;;  %vm912_vm12 = vweird.f32 %v1490_v63 }
 0x5f7   : > { %1491 = vrcp.f32 %v901_v62  ;;  %vm913_vm14 = vmor %vm911_vm13, %vm912_vm12  ;;  %v932_v40 = vand.u32 2147483648, %v901_v62  ;;  %v930_v18 = vand.u32 2147483647, %v901_v62  ;;  %vm926_vm1 = vweird.f32 %v901_v62 }
 0x5f8   : > { %v908_v1 = vsub.f32 1.0, %v907_v0 }
 0x5f9   : > { %v933_v61 = vor.u32 1.1754944e-38, %v932_v40  ;;  %vm931_vm3 = vcmp.eq.f32.partialorder %v930_v18, 8.507059e+37 }
 0x5fa   : > { %v909_v10 = vmul.f32 %v1490_v63, %v908_v1 }
 0x5fc   : > { %v910_v12 = vadd.f32 %v1490_v63, %v909_v10 }
 0x5fd   : > { %v1492_v30 = vpop.eup %1491 }
 0x5fe   : > { %v922_v8 = vmul.f32 %v1492_v30, %v901_v62  ;;  %v903_v60 = vpop.xlane.xlu1 %902  ;;  %v914_v23 = vsel %vm913_vm14, %v1490_v63, %v910_v12  ;;  %vm927_vm0 = vweird.f32 %v1492_v30 }
 0x5ff   : > { %1493 = vrcp.f32 %v903_v60  ;;  %v919_v41 = vsel %vm916_vm15, %v918_v16, %v914_v23  ;;  %vm928_vm2 = vmor %vm926_vm1, %vm927_vm0  ;;  %v945_v34 = vand.u32 2147483647, %v903_v60  ;;  %v947_v29 = vand.u32 2147483648, %v903_v60 }
 0x600   : > { %v923_v25 = vsub.f32 1.0, %v922_v8  ;;  %v920_v13 = vmul.f32 %v919_v41, %v894_v14  ;;  %vm941_vm5 = vweird.f32 %v903_v60 }
 0x601   : > { %v948_v2 = vor.u32 1.1754944e-38, %v947_v29  ;;  %vm946_vm7 = vcmp.eq.f32.partialorder %v945_v34, 8.507059e+37 }
 0x602   : > { %v924_v15 = vmul.f32 %v1492_v30, %v923_v25  ;;  %v966_v53 = vmul.f32 %v920_v13, %v2059_v46 }
 0x604   : > { %v925_v27 = vadd.f32 %v1492_v30, %v924_v15 }
 0x605   : > { %v1494_v47 = vpop.eup %1493 }
 0x606   : > { %v929_v28 = vsel %vm928_vm2, %v1492_v30, %v925_v27  ;;  %v937_v50 = vmul.f32 %v1494_v47, %v903_v60  ;;  %v905_v31 = vpop.xlane.xlu2 %904  ;;  %vm942_vm4 = vweird.f32 %v1494_v47 }
 0x607   : > { %v934_v20 = vsel %vm931_vm3, %v933_v61, %v929_v28  ;;  %1495 = vrcp.f32 %v905_v31  ;;  %vm943_vm6 = vmor %vm941_vm5, %vm942_vm4  ;;  %v962_v36 = vand.u32 2147483648, %v905_v31  ;;  %v960_v43 = vand.u32 2147483647, %v905_v31 }
 0x608   : > { %v935_v33 = vmul.f32 %v934_v20, %v895_v17  ;;  %v938_v39 = vsub.f32 1.0, %v937_v50  ;;  %vm956_vm9 = vweird.f32 %v905_v31 }
 0x609   : > { %v963_v48 = vor.u32 1.1754944e-38, %v962_v36  ;;  %vm961_vm11 = vcmp.eq.f32.partialorder %v960_v43, 8.507059e+37 }
 0x60a   : > { %v967_v56 = vmul.f32 %v935_v33, %v2077_v11  ;;  %v939_v3 = vmul.f32 %v1494_v47, %v938_v39 }
 0x60c   : > { %v940_v51 = vadd.f32 %v1494_v47, %v939_v3  ;;  %v970_v6 = vadd.f32 %v967_v56, %v966_v53 }
 0x60d   : > { %v1496_v37 = vpop.eup %1495 }
 0x60e   : > { %v944_v55 = vsel %vm943_vm6, %v1494_v47, %v940_v51  ;;  %v952_v5 = vmul.f32 %v1496_v37, %v905_v31  ;;  %vm957_vm8 = vweird.f32 %v1496_v37 }
 0x60f   : > { %v949_v21 = vsel %vm946_vm7, %v948_v2, %v944_v55  ;;  %vm958_vm10 = vmor %vm956_vm9, %vm957_vm8 }
 0x610   : > { %v950_v45 = vmul.f32 %v949_v21, %v896_v7  ;;  %v953_v59 = vsub.f32 1.0, %v952_v5 }
 0x612   : > { %v968_v54 = vmul.f32 %v950_v45, %v2117_v42  ;;  %v954_v32 = vmul.f32 %v1496_v37, %v953_v59 }
 0x614   : > { %v955_v19 = vadd.f32 %v1496_v37, %v954_v32  ;;  %v971_v52 = vadd.f32 %v970_v6, %v968_v54 }
 0x616   : > { %v959_v24 = vsel %vm958_vm10, %v1496_v37, %v955_v19 }
 0x617   : > { %v964_v4 = vsel %vm961_vm11, %v963_v48, %v959_v24 }
 0x618   : > { %v965_v63 = vmul.f32 %v964_v4, %v897_v35 }
 0x61a   : > { %v969_v0 = vmul.f32 %v965_v63, %v2115_v58 }
 0x61c   : > { %v972_v62 = vadd.f32 %v971_v52, %v969_v0 }
 0x61e   : > { %v973_v1 = vrot.slane %v972_v62, 4 }
 0x620   : > { %v974_v10 = vadd.f32 %v973_v1, %v972_v62 }
 0x622   : > { %v975_v12 = vrot.slane %v974_v10, 2 }
 0x624   : > { %v976_v30 = vadd.f32 %v975_v12, %v974_v10 }
 0x626   : > { %v977_v38 = vrot.slane %v976_v30, 1 }
 0x628   : > { %v978_v9 = vadd.f32 %v977_v38, %v976_v30 }
 0x62a   : > { %v979_v8 = vmul.f32 %v978_v9, %v978_v9 }
 0x62c   : > { %996 = vmatmul.f32.vlgmr.msrb.gmra.mxu0 %v979_v8 }
 0x6a9   : > { %v997_v60 = vpop.f32.mrf.mxu0 }
 0x6aa   : > { %1497 = vrsqrt.f32 %v997_v60  ;;  %vm1007_vm12 = vcmp.eq.f32.partialorder %v997_v60, inf  ;;  %v1010_v41 = vand.u32 2147483648, %v997_v60  ;;  %vm1009_vm13 = vcmp.eq.f32.partialorder %v997_v60, 0.0 }
 0x6ab   : > { %v1012_v47 = vadd.f32 1.0, %v997_v60 }
 0x6b0   : > { %v1498_v23 = vpop.eup %1497 }
 0x6b1   : > { %v1001_v25 = vmul.f32 %v1498_v23, %v997_v60 }
 0x6b3   : > { %v1002_v49 = vmul.f32 %v1498_v23, %v1001_v25 }
 0x6b5   : > { %v1003_v16 = vmul.f32 0.5, %v1002_v49 }
 0x6b7   : > { %v1004_v40 = vsub.f32 1.5, %v1003_v16 }
 0x6b9   : > { %v1005_v15 = vmul.f32 %v1498_v23, %v1004_v40 }
 0x6bb   : > { %v1006_v18 = vmul.f32 %v1005_v15, %v997_v60 }
 0x6bd   : > { %v1008_v14 = vsel %vm1007_vm12, %v997_v60, %v1006_v18 }
 0x6be   : > { %v1011_v27 = vsel %vm1009_vm13, %v1010_v41, %v1008_v14 }
 0x6bf   : > { %v1013_v17 = vadd.f32 1e-20, %v1011_v27 }
 0x6c1   : > { %v1014_v61 = vmul.f32 %v1013_v17, %v1012_v47 }
 0x6c3   : > { %1499 = vrcp.f32 %v1014_v61  ;;  %v1026_v31 = vand.u32 2147483648, %v1014_v61  ;;  %v1024_v33 = vand.u32 2147483647, %v1014_v61  ;;  %vm1020_vm15 = vweird.f32 %v1014_v61 }
 0x6c5   : > { %v1027_v34 = vor.u32 1.1754944e-38, %v1026_v31  ;;  %vm1025_vm1 = vcmp.eq.f32.partialorder %v1024_v33, 8.507059e+37 }
 0x6c9   : > { %v1500_v13 = vpop.eup %1499 }
 0x6ca   : > { %v1016_v28 = vmul.f32 %v1500_v13, %v1014_v61  ;;  %vm1021_vm14 = vweird.f32 %v1500_v13 }
 0x6cb   : > { %vm1022_vm0 = vmor %vm1020_vm15, %vm1021_vm14 }
 0x6cc   : > { %v1017_v50 = vsub.f32 1.0, %v1016_v28 }
 0x6ce   : > { %v1018_v20 = vmul.f32 %v1500_v13, %v1017_v50 }
 0x6d0   : > { %v1019_v39 = vadd.f32 %v1500_v13, %v1018_v20 }
 0x6d2   : > { %v1023_v29 = vsel %vm1022_vm0, %v1500_v13, %v1019_v39 }
 0x6d3   : > { %v1028_v53 = vsel %vm1025_vm1, %v1027_v34, %v1023_v29 }
 0x6d4   : > { %v1029_v56 = vmul.f32 %v1028_v53, %v997_v60 }
 0x6d6   : > { %v1030_v3 = vmul.f32 %v1029_v56, %v978_v9 }
 0x6d8   : > { %v1031_v51 = vperm.slane %v1030_v3, 0 }
 0x6da   : > { %v1032_v6 = vmul.f32 %v1031_v51, %v2059_v46  ;;  %v1034_v37 = vmul.f32 %v1031_v51, %v2117_v42  ;;  %v1033_v2 = vmul.f32 %v1031_v51, %v2077_v11  ;;  %v1035_v7 = vmul.f32 %v1031_v51, %v2115_v58 }
 0x6dc   : > { %1052 = vmatmul.f32.vlgmr.msrb.gmra.mxu1 %v1032_v6  ;;  %1058 = vmatmul.f32.vlgmr.msrb.gmra.mxu3 %v1034_v37 }
 0x6e4   : > { %1055 = vmatmul.f32.gmra.mxu1 %v1033_v2  ;;  %1061 = vmatmul.f32.gmra.mxu3 %v1035_v7 }
 0x759   : > { %v1053_v55 = vpop.f32.mrf.mxu1 }
 0x75a   : > { %v1065_v5 = vadd.f32 %v1053_v55, %v2204_v57 }
 0x75c   : > { %1069 = vmax.xlane.f32.xlu0 %v1065_v5 }
 0x75f   : > { %v1059_v21 = vpop.f32.mrf.mxu3 }
 0x760   : > { %v1067_v45 = vadd.f32 %v1059_v21, %v2212_v22 }
 0x761   : > { %v1056_v59 = vpop.f32.mrf.mxu1 }
 0x762   : > { %v1066_v36 = vadd.f32 %v1056_v59, %v2208_v44  ;;  %1073 = vmax.xlane.f32.xlu2 %v1067_v45 }
 0x764   : > { %1071 = vmax.xlane.f32.xlu1 %v1066_v36 }
 0x767   : > { %v1062_v54 = vpop.f32.mrf.mxu3 }
 0x768   : > { %v1068_v32 = vadd.f32 %v1062_v54, %v2216_v26 }
 0x76a   : > { %1075 = vmax.xlane.f32.xlu0 %v1068_v32 }
 0x7cf   : > { %v1070_v43 = vpop.xlane.xlu0 %1069 }
 0x7d0   : > { %v1077_v19 = vsub.f32 %v1065_v5, %v1070_v43 }
 0x7d2   : > { %v1081_v52 = vmul.f32 1.442695, %v1077_v19 }
 0x7d4   : > { %1501 = vpow2.f32 %v1081_v52 }
 0x7d5   : > { %v1074_v48 = vpop.xlane.xlu2 %1073 }
 0x7d6   : > { %v1079_v35 = vsub.f32 %v1067_v45, %v1074_v48 }
 0x7d7   : > { %v1072_v57 = vpop.xlane.xlu1 %1071 }
 0x7d8   : > { %v1085_v24 = vmul.f32 1.442695, %v1079_v35  ;;  %v1078_v4 = vsub.f32 %v1066_v36, %v1072_v57 }
 0x7da   : > { %v1502_v63 = vpop.eup %1501  ;;  %1503 = vpow2.f32 %v1085_v24  ;;  %v1083_v22 = vmul.f32 1.442695, %v1078_v4 }
 0x7db   : > { %1093 = vadd.xlane.f32.xlu1 %v1502_v63  ;;  %v1089_v53 = vmul.f32 16.0, %v1502_v63 }
 0x7dc   : > { %1505 = vpow2.f32 %v1083_v22 }
 0x7dd   : > { %v1076_v44 = vpop.xlane.xlu0 %1075 }
 0x7de   : > { %v1080_v0 = vsub.f32 %v1068_v32, %v1076_v44 }
 0x7e0   : > { %v1504_v62 = vpop.eup %1503  ;;  %v1087_v1 = vmul.f32 1.442695, %v1080_v0 }
 0x7e1   : > { %1097 = vadd.xlane.f32.xlu0 %v1504_v62  ;;  %v1091_v2 = vmul.f32 16.0, %v1504_v62 }
 0x7e2   : > { %v1506_v26 = vpop.eup %1505  ;;  %1507 = vpow2.f32 %v1087_v1 }
 0x7e3   : > { %1095 = vadd.xlane.f32.xlu2 %v1506_v26  ;;  %v1090_v7 = vmul.f32 16.0, %v1506_v26 }
 0x7e8   : > { %v2239_v10 = vpop.eup %1507 }
 0x7e9   : > { %1099 = vadd.xlane.f32.xlu1 %v2239_v10  ;;  %v1092_v24 = vmul.f32 16.0, %v2239_v10 }
 0x84e   : > { %v1094_v12 = vpop.xlane.xlu1 %1093 }
 0x84f   : > { %1509 = vrcp.f32 %v1094_v12  ;;  %v1110_v18 = vand.u32 2147483647, %v1094_v12  ;;  %v1112_v41 = vand.u32 2147483648, %v1094_v12  ;;  %vm1106_vm3 = vweird.f32 %v1094_v12 }
 0x851   : > { %vm1111_vm6 = vcmp.eq.f32.partialorder %v1110_v18, 8.507059e+37  ;;  %v1113_v31 = vor.u32 1.1754944e-38, %v1112_v41 }
 0x854   : > { %v1098_v30 = vpop.xlane.xlu0 %1097 }
 0x855   : > { %v1510_v38 = vpop.eup %1509  ;;  %1511 = vrcp.f32 %v1098_v30  ;;  %v1140_v17 = vand.u32 2147483647, %v1098_v30  ;;  %v1142_v61 = vand.u32 2147483648, %v1098_v30  ;;  %vm1136_vm7 = vweird.f32 %v1098_v30 }
 0x856   : > { %v1102_v9 = vmul.f32 %v1510_v38, %v1094_v12  ;;  %v1096_v8 = vpop.xlane.xlu2 %1095  ;;  %vm1107_vm2 = vweird.f32 %v1510_v38 }
 0x857   : > { %1513 = vrcp.f32 %v1096_v8  ;;  %vm2242_vm4 = vmor %vm1106_vm3, %vm1107_vm2  ;;  %v1127_v20 = vand.u32 2147483648, %v1096_v8  ;;  %v1125_v34 = vand.u32 2147483647, %v1096_v8  ;;  %vm1141_vm10 = vcmp.eq.f32.partialorder %v1140_v17, 8.507059e+37 }
 0x858   : > { %v1103_v60 = vsub.f32 1.0, %v1102_v9  ;;  %v1143_v3 = vor.u32 1.1754944e-38, %v1142_v61  ;;  %vm1121_vm11 = vweird.f32 %v1096_v8 }
 0x859   : > { %v1128_v5 = vor.u32 1.1754944e-38, %v1127_v20  ;;  %vm1126_vm13 = vcmp.eq.f32.partialorder %v1125_v34, 8.507059e+37 }
 0x85a   : > { %v1104_v23 = vmul.f32 %v1510_v38, %v1103_v60 }
 0x85b   : > { %v1512_v25 = vpop.eup %1511 }
 0x85c   : > { %v1105_v49 = vadd.f32 %v1510_v38, %v1104_v23  ;;  %v1132_v16 = vmul.f32 %v1512_v25, %v1098_v30  ;;  %v1100_v40 = vpop.xlane.xlu1 %1099  ;;  %vm1137_vm5 = vweird.f32 %v1512_v25 }
 0x85d   : > { %v1514_v15 = vpop.eup %1513  ;;  %1515 = vrcp.f32 %v1100_v40  ;;  %vm1138_vm9 = vmor %vm1136_vm7, %vm1137_vm5  ;;  %v1155_v54 = vand.u32 2147483647, %v1100_v40  ;;  %v1157_v32 = vand.u32 2147483648, %v1100_v40  ;;  %vm1151_vm15 = vweird.f32 %v1100_v40 }
 0x85e   : > { %v1133_v14 = vsub.f32 1.0, %v1132_v16  ;;  %v1117_v27 = vmul.f32 %v1514_v15, %v1096_v8  ;;  %v1109_v13 = vsel %vm2242_vm4, %v1510_v38, %v1105_v49  ;;  %vm1122_vm8 = vweird.f32 %v1514_v15 }
 0x85f   : > { %v1114_v56 = vsel %vm1111_vm6, %v1113_v31, %v1109_v13  ;;  %vm1123_vm12 = vmor %vm1121_vm11, %vm1122_vm8  ;;  %v1158_v4 = vor.u32 1.1754944e-38, %v1157_v32  ;;  %vm1156_vm1 = vcmp.eq.f32.partialorder %v1155_v54, 8.507059e+37 }
 0x860   : > { %v1134_v28 = vmul.f32 %v1512_v25, %v1133_v14  ;;  %v1118_v50 = vsub.f32 1.0, %v1117_v27  ;;  %v1115_v21 = vmul.f32 %v1114_v56, %v1089_v53 }
 0x862   : > { %v1135_v33 = vadd.f32 %v1512_v25, %v1134_v28  ;;  %v1119_v39 = vmul.f32 %v1514_v15, %v1118_v50  ;;  %v1161_v48 = vmul.f32 %v1115_v21, %v2059_v46 }
 0x863   : > { %v1516_v29 = vpop.eup %1515 }
 0x864   : > { %v1139_v51 = vsel %vm1138_vm9, %v1512_v25, %v1135_v33  ;;  %v1120_v6 = vadd.f32 %v1514_v15, %v1119_v39  ;;  %v1147_v37 = vmul.f32 %v1516_v29, %v1100_v40  ;;  %vm1152_vm14 = vweird.f32 %v1516_v29 }
 0x865   : > { %v1144_v55 = vsel %vm1141_vm10, %v1143_v3, %v1139_v51  ;;  %vm1153_vm0 = vmor %vm1151_vm15, %vm1152_vm14 }
 0x866   : > { %v1124_v45 = vsel %vm1123_vm12, %v1514_v15, %v1120_v6  ;;  %v1148_v59 = vsub.f32 1.0, %v1147_v37  ;;  %v1145_v43 = vmul.f32 %v1144_v55, %v1091_v2 }
 0x867   : > { %v1129_v36 = vsel %vm1126_vm13, %v1128_v5, %v1124_v45 }
 0x868   : > { %v1130_v19 = vmul.f32 %v1129_v36, %v1090_v7  ;;  %v1149_v52 = vmul.f32 %v1516_v29, %v1148_v59  ;;  %v1163_v63 = vmul.f32 %v1145_v43, %v2117_v42 }
 0x86a   : > { %v1162_v35 = vmul.f32 %v1130_v19, %v2077_v11  ;;  %v1150_v57 = vadd.f32 %v1516_v29, %v1149_v52 }
 0x86c   : > { %v1165_v22 = vadd.f32 %v1162_v35, %v1161_v48  ;;  %v1154_v44 = vsel %vm1153_vm0, %v1516_v29, %v1150_v57 }
 0x86d   : > { %v1159_v0 = vsel %vm1156_vm1, %v1158_v4, %v1154_v44 }
 0x86e   : > { %v1160_v62 = vmul.f32 %v1159_v0, %v1092_v24  ;;  %v1166_v1 = vadd.f32 %v1165_v22, %v1163_v63 }
 0x870   : > { %v1164_v26 = vmul.f32 %v1160_v62, %v2115_v58 }
 0x872   : > { %v1167_v12 = vadd.f32 %v1166_v1, %v1164_v26 }
 0x874   : > { %v1168_v46 = vrot.slane %v1167_v12, 4 }
 0x876   : > { %v1169_v30 = vadd.f32 %v1168_v46, %v1167_v12 }
 0x878   : > { %v1170_v11 = vrot.slane %v1169_v30, 2 }
 0x87a   : > { %v1171_v38 = vadd.f32 %v1170_v11, %v1169_v30 }
 0x87c   : > { %v1172_v9 = vrot.slane %v1171_v38, 1 }
 0x87e   : > { %v1173_v8 = vadd.f32 %v1172_v9, %v1171_v38 }
 0x880   : > { %v1174_v10 = vmul.f32 %v1173_v8, %v1173_v8 }
 0x882   : > { %1191 = vmatmul.f32.vlgmr.msrb.gmra.mxu2 %v1174_v10 }
 0x905   : > { %v1192_v60 = vpop.f32.mrf.mxu2 }
 0x906   : > { %1517 = vrsqrt.f32 %v1192_v60  ;;  %vm1202_vm2 = vcmp.eq.f32.partialorder %v1192_v60, inf  ;;  %v1205_v58 = vand.u32 2147483648, %v1192_v60  ;;  %vm1204_vm3 = vcmp.eq.f32.partialorder %v1192_v60, 0.0 }
 0x907   : > { %v1207_v14 = vadd.f32 1.0, %v1192_v60 }
 0x90c   : > { %v1518_v42 = vpop.eup %1517 }
 0x90d   : > { %v1196_v23 = vmul.f32 %v1518_v42, %v1192_v60 }
 0x90f   : > { %v1197_v25 = vmul.f32 %v1518_v42, %v1196_v23 }
 0x911   : > { %v1198_v49 = vmul.f32 0.5, %v1197_v25 }
 0x913   : > { %v1199_v16 = vsub.f32 1.5, %v1198_v49 }
 0x915   : > { %v1200_v40 = vmul.f32 %v1518_v42, %v1199_v16 }
 0x917   : > { %v1201_v15 = vmul.f32 %v1200_v40, %v1192_v60 }
 0x919   : > { %v1203_v18 = vsel %vm1202_vm2, %v1192_v60, %v1201_v15 }
 0x91a   : > { %v1206_v41 = vsel %vm1204_vm3, %v1205_v58, %v1203_v18 }
 0x91b   : > { %v1208_v27 = vadd.f32 1e-20, %v1206_v41 }
 0x91d   : > { %v1209_v47 = vmul.f32 %v1208_v27, %v1207_v14 }
 0x91f   : > { %1519 = vrcp.f32 %v1209_v47  ;;  %v1221_v28 = vand.u32 2147483648, %v1209_v47  ;;  %v1219_v31 = vand.u32 2147483647, %v1209_v47  ;;  %vm1215_vm5 = vweird.f32 %v1209_v47 }
 0x921   : > { %v1222_v33 = vor.u32 1.1754944e-38, %v1221_v28  ;;  %vm1220_vm7 = vcmp.eq.f32.partialorder %v1219_v31, 8.507059e+37 }
 0x925   : > { %v1520_v17 = vpop.eup %1519 }
 0x926   : > { %v1211_v61 = vmul.f32 %v1520_v17, %v1209_v47  ;;  %vm1216_vm4 = vweird.f32 %v1520_v17 }
 0x927   : > { %vm1217_vm6 = vmor %vm1215_vm5, %vm1216_vm4 }
 0x928   : > { %v1212_v13 = vsub.f32 1.0, %v1211_v61 }
 0x92a   : > { %v1213_v50 = vmul.f32 %v1520_v17, %v1212_v13 }
 0x92c   : > { %v1214_v20 = vadd.f32 %v1520_v17, %v1213_v50 }
 0x92e   : > { %v1218_v39 = vsel %vm1217_vm6, %v1520_v17, %v1214_v20 }
 0x92f   : > { %v1223_v34 = vsel %vm1220_vm7, %v1222_v33, %v1218_v39 }
 0x930   : > { %v1224_v29 = vmul.f32 %v1223_v34, %v1192_v60 }
 0x932   : > { %v1225_v53 = vmul.f32 %v1224_v29, %v1173_v8 }
 0x934   : > { %1226 = vst [vmem:[%s223_s14] sm:$0x1] %v1225_v53 }
 0x935   : > { %1608 = shalt.err (!%p1605_p8)
}
 0x936   : > { %1354 = dma.vmem_to_hbm [thread:$0]  (%p1728_p5), %s1239_s20, 16, %s1241_s22, %s1228_s23  }
 0x937 PF: > { %p1371_p9 = scmp.ge.s32.totalorder %s1651_s18, 2  ;;  %s1252_s7 = sand.u32 1, %s1639_s15  }
 0x938   : > { %s1253_s8 = scalar_lea.sflag [#allocation4], %s1252_s7 }
 0x939   : > { %p1364_p10 = pnand %p1371_p9, %p1732_p6 }
 0x93b   : > { %p1365_p11 = pneg %p1364_p10 }
 0x93d   : > { %1634 = dma.done.wait (%p1365_p11), %s1253_s8, 16  }
 0x93e   : > { %1636 = vsyncadd (%p1365_p11), %s1253_s8, 4294967280  ;;  %p16_p12 = scmp.ge.s32.totalorder %s1715_s21, 4   ;;  %s2304_s15 = smov %s1643_s16 }
 0x93f   : > { %s2305_s16 = smov %s1647_s17  ;;  %s2306_s17 = smov %s1726_s24 }
 0x940   : > { %s2307_s18 = smov %s1715_s21  ;;  %18 = sbr.rel (!%p16_p12) target bundleno = 5 (0x5), region = 87 }
 0x945   :  { %1258 = vsyncpa [#allocation3], 1 }
 0x946   :  { %1260 = vsyncpa [#allocation3 + $0x1], 1 }
 0x947   :  { %1261 = vsyncpa [#allocation6], 1 }
 0x948   :  { %1262 = vsyncpa [#allocation4], 1 }
 0x949   :  { %1264 = vsyncpa [#allocation4 + $0x1], 1 }

</bundles_post_ra>
